<compile_context>
chip_gen: v7x
topology: tpu7x:2x2x1
jax: 0.10.0
libtpu: 0.0.40
codegen_flags: <defaults>
</compile_context>

<pallas_src>
import functools

import numpy as np
import jax
import jax.image
import jax.numpy as jnp
from jax.experimental import pallas as pl
from jax.experimental.pallas import tpu as pltpu

_EPS = 1e-5
_VMEM = pltpu.MemorySpace.VMEM


# ------------------------------ fused kernel --------------------------------

def _netg2_kernel(z_ref,
                  u1_ref, r1_ref, u2_ref, r2_ref,
                  u3_ref, r3_ref, u4_ref, r4_ref,
                  bb1_ref, g1_ref, b1_ref,
                  bb2_ref, g2_ref, b2_ref,
                  bb3_ref, g3_ref, b3_ref,
                  al_ref, art_ref,
                  o_ref,
                  *, n_batch, n_chan, counts):
    """Whole _netG2 forward on VMEM-resident tiles (single invocation)."""

    def convt(y, u_ref, r_ref):
        # y: (N*Hin, Cin*Win)  ->  (N*Hout, Cout*Wout)
        y_bf = y.astype(jnp.bfloat16)
        acc = None
        for kh in range(4):
            t = jnp.dot(y_bf, r_ref[kh], preferred_element_type=jnp.float32)
            c = jnp.dot(u_ref[kh], t, preferred_element_type=jnp.float32)
            acc = c if acc is None else acc + c
        return acc

    def bn_relu(x, bb_ref, g_ref, b_ref, cnt):
        # x: (N*H, C*W); training-mode batch stats, one-pass (sum, sum-sq).
        inv = 1.0 / cnt
        rsum = jnp.sum(x, axis=0, keepdims=True)                    # (1, C*W)
        rsq = jnp.sum(x * x, axis=0, keepdims=True)                 # (1, C*W)
        mean = jnp.dot(rsum, bb_ref[...],
                       preferred_element_type=jnp.float32) * inv
        msq = jnp.dot(rsq, bb_ref[...],
                      preferred_element_type=jnp.float32) * inv
        var = msq - mean * mean
        scale = g_ref[...] * jax.lax.rsqrt(var + _EPS)
        shift = b_ref[...] - mean * scale
        return jnp.maximum(x * scale + shift, 0.0)

    x = convt(z_ref[...], u1_ref, r1_ref)                 # (N*4,  c1*4)
    x = bn_relu(x, bb1_ref, g1_ref, b1_ref, counts[0])
    x = convt(x, u2_ref, r2_ref)                          # (N*8,  c2*8)
    x = bn_relu(x, bb2_ref, g2_ref, b2_ref, counts[1])
    x = convt(x, u3_ref, r3_ref)                          # (N*16, c3*16)
    x = bn_relu(x, bb3_ref, g3_ref, b3_ref, counts[2])
    x = convt(x, u4_ref, r4_ref)                          # (N*32, nc*32)

    t = jnp.tanh(x)                                       # f32, (N*32, nc*32)
    # Height resize for all (n, c) planes at once: (N*64, N*32) @ (N*32, nc*32)
    up_h = jnp.dot(al_ref[...], t, preferred_element_type=jnp.float32)
    # Width resize per channel; write rows in (n, c, oh) order -> free NCHW
    # reshape outside the kernel.
    for c in range(n_chan):
        blk = jnp.dot(up_h[:, c * 32:(c + 1) * 32], art_ref[...],
                      preferred_element_type=jnp.float32)           # (N*64, 64)
        for n in range(n_batch):
            dst = (n * n_chan + c) * 64
            o_ref[dst:dst + 64, :] = blk[n * 64:(n + 1) * 64, :]


# --------------------------- host-side weight prep --------------------------

def _bilinear_matrix(out_size, in_size):
    """F.interpolate(mode='bilinear', align_corners=False) as a matrix."""
    i = np.arange(out_size, dtype=np.float64)
    src = np.maximum((i + 0.5) * (in_size / out_size) - 0.5, 0.0)
    i0 = np.floor(src).astype(np.int64)
    frac = src - i0
    i1 = np.minimum(i0 + 1, in_size - 1)
    a = np.zeros((out_size, in_size), np.float32)
    a[np.arange(out_size), i0] += (1.0 - frac)
    a[np.arange(out_size), i1] += frac
    return a


def _build_u(n, h_in, h_out, stride, pad):
    """0/1 height scatter: row (n, oh = stride*h + kh - pad) <- row (n, h)."""
    u = np.zeros((4, n * h_out, n * h_in), np.float32)
    for kh in range(4):
        for h in range(h_in):
            oh = stride * h + kh - pad
            if 0 <= oh < h_out:
                u[kh, np.arange(n) * h_out + oh, np.arange(n) * h_in + h] = 1.0
    return u


def _build_r(w, w_in, w_out, stride, pad):
    """Weights + width scatter: R[kh][(cin,w),(co,ow)] = w[cin,co,kh,ow-s*w+p]."""
    w = np.asarray(w, np.float32)
    c_in, c_out, k, _ = w.shape
    r = np.zeros((k, c_in * w_in, c_out * w_out), np.float32)
    for kh in range(k):
        for kw in range(k):
            for wi in range(w_in):
                ow = stride * wi + kw - pad
                if 0 <= ow < w_out:
                    r[kh, wi::w_in, ow::w_out] = w[:, :, kh, kw]
    return r


def prepare_inputs(params, batch):
    """One-time host-side prep of all kernel constants (hoisted out of jit)."""
    w1 = np.asarray(params["w1"], np.float32)
    w2 = np.asarray(params["w2"], np.float32)
    w3 = np.asarray(params["w3"], np.float32)
    w4 = np.asarray(params["w4"], np.float32)
    c1, c2, c3 = w1.shape[1], w2.shape[1], w3.shape[1]
    a64 = _bilinear_matrix(64, 32)

    def bcast(v, w_sp):
        return np.repeat(np.asarray(v, np.float32), w_sp)[None, :]

    def blocksum(c, w_sp):
        return np.kron(np.eye(c, dtype=np.float32),
                       np.ones((w_sp, w_sp), np.float32))

    bf, f32 = jnp.bfloat16, jnp.float32
    return {
        "u1": jnp.asarray(_build_u(batch, 1, 4, 1, 0), f32),
        "r1": jnp.asarray(_build_r(w1, 1, 4, 1, 0), bf),
        "u2": jnp.asarray(_build_u(batch, 4, 8, 2, 1), f32),
        "r2": jnp.asarray(_build_r(w2, 4, 8, 2, 1), bf),
        "u3": jnp.asarray(_build_u(batch, 8, 16, 2, 1), f32),
        "r3": jnp.asarray(_build_r(w3, 8, 16, 2, 1), bf),
        "u4": jnp.asarray(_build_u(batch, 16, 32, 2, 1), f32),
        "r4": jnp.asarray(_build_r(w4, 16, 32, 2, 1), bf),
        "bb1": jnp.asarray(blocksum(c1, 4), f32),
        "g1": jnp.asarray(bcast(params["g1"], 4), f32),
        "b1": jnp.asarray(bcast(params["b1"], 4), f32),
        "bb2": jnp.asarray(blocksum(c2, 8), f32),
        "g2": jnp.asarray(bcast(params["g2"], 8), f32),
        "b2": jnp.asarray(bcast(params["b2"], 8), f32),
        "bb3": jnp.asarray(blocksum(c3, 16), f32),
        "g3": jnp.asarray(bcast(params["g3"], 16), f32),
        "b3": jnp.asarray(bcast(params["b3"], 16), f32),
        "al": jnp.asarray(np.kron(np.eye(batch, dtype=np.float32), a64), f32),
        "art": jnp.asarray(a64.T.copy(), f32),
    }


# --------------------------------- forward ----------------------------------

def netg2_forward(prep, z):
    """z: (N, nz, 1, 1) NCHW -> (N, nc, 64, 64) NCHW (one pallas_call)."""
    n = z.shape[0]
    nc = prep["r4"].shape[2] // 32
    z2 = z.reshape(n, -1).astype(jnp.bfloat16)        # rows (n,h=0), cols (cin,w=0)
    counts = (float(n * 16), float(n * 64), float(n * 256))
    kernel = functools.partial(_netg2_kernel, n_batch=n, n_chan=nc,
                               counts=counts)
    args = (z2,
            prep["u1"], prep["r1"], prep["u2"], prep["r2"],
            prep["u3"], prep["r3"], prep["u4"], prep["r4"],
            prep["bb1"], prep["g1"], prep["b1"],
            prep["bb2"], prep["g2"], prep["b2"],
            prep["bb3"], prep["g3"], prep["b3"],
            prep["al"], prep["art"])
    out = pl.pallas_call(
        kernel,
        out_shape=jax.ShapeDtypeStruct((n * nc * 64, 64), jnp.float32),
        in_specs=[pl.BlockSpec(memory_space=_VMEM)] * len(args),
        out_specs=pl.BlockSpec(memory_space=_VMEM),
    )(*args)
    # Rows are already in (n, c, oh) order -> metadata-only reshape to NCHW.
    return out.reshape(n, nc, 64, 64)


# ------------------------------ init / reference ----------------------------

def init_params(key, nz, ngf, nc):
    c1, c2, c3 = ngf // 2, ngf // 4, ngf // 8
    ks = jax.random.split(key, 7)
    return {
        # ConvTranspose2d weights: (C_in, C_out, 4, 4), N(0, 0.02)
        "w1": 0.02 * jax.random.normal(ks[0], (nz, c1, 4, 4), jnp.float32),
        "w2": 0.02 * jax.random.normal(ks[1], (c1, c2, 4, 4), jnp.float32),
        "w3": 0.02 * jax.random.normal(ks[2], (c2, c3, 4, 4), jnp.float32),
        "w4": 0.02 * jax.random.normal(ks[3], (c3, nc, 4, 4), jnp.float32),
        # BatchNorm affine: gamma ~ N(1, 0.02), beta = 0
        "g1": 1.0 + 0.02 * jax.random.normal(ks[4], (c1,), jnp.float32),
        "b1": jnp.zeros((c1,), jnp.float32),
        "g2": 1.0 + 0.02 * jax.random.normal(ks[5], (c2,), jnp.float32),
        "b2": jnp.zeros((c2,), jnp.float32),
        "g3": 1.0 + 0.02 * jax.random.normal(ks[6], (c3,), jnp.float32),
        "b3": jnp.zeros((c3,), jnp.float32),
    }


def reference_forward(params, z):
    """Pure-JAX (non-Pallas) f32 reference of the PyTorch module."""
    def convt(x, w, stride, pad):
        k = w.shape[2]
        w_t = jnp.flip(w, (2, 3)).transpose(1, 0, 2, 3)       # (Cout, Cin, k, k)
        return jax.lax.conv_general_dilated(
            x, w_t, window_strides=(1, 1),
            padding=[(k - 1 - pad, k - 1 - pad)] * 2,
            lhs_dilation=(stride, stride),
            dimension_numbers=("NCHW", "OIHW", "NCHW"),
            precision=jax.lax.Precision.HIGHEST)

    def bn_relu(x, g, b):
        m = jnp.mean(x, axis=(0, 2, 3), keepdims=True)
        v = jnp.mean(jnp.square(x - m), axis=(0, 2, 3), keepdims=True)
        y = (x - m) * jax.lax.rsqrt(v + _EPS)
        y = y * g.reshape(1, -1, 1, 1) + b.reshape(1, -1, 1, 1)
        return jnp.maximum(y, 0.0)

    x = convt(z, params["w1"], 1, 0)
    x = bn_relu(x, params["g1"], params["b1"])
    x = convt(x, params["w2"], 2, 1)
    x = bn_relu(x, params["g2"], params["b2"])
    x = convt(x, params["w3"], 2, 1)
    x = bn_relu(x, params["g3"], params["b3"])
    x = convt(x, params["w4"], 2, 1)
    x = jnp.tanh(x)
    return jax.image.resize(x, (x.shape[0], x.shape[1], 64, 64),
                            method="bilinear")


# ----------------------------------- main ------------------------------------

if __name__ == "__main__":
    nz, ngf, nc, batch = 32, 32, 3, 2

    key = jax.random.PRNGKey(0)
    kp, kz = jax.random.split(key)
    params = init_params(kp, nz, ngf, nc)
    z = jax.random.normal(kz, (batch, nz, 1, 1), jnp.float32)

    prep = prepare_inputs(params, batch)          # host-side, one-time
    fwd = jax.jit(netg2_forward)
    out = jax.block_until_ready(fwd(prep, z))

    assert out.shape == (batch, nc, 64, 64), out.shape
    assert bool(jnp.all(jnp.isfinite(out)))

    ref = jax.jit(reference_forward)(params, z)
    max_err = float(jnp.max(jnp.abs(out - ref)))
    assert max_err < 5e-2, f"max abs error vs reference: {max_err}"
    print("KERNEL_OK")
</pallas_src>

<mosaic_0001>
module attributes {stable_mosaic.version = 11 : i64} {
  func.func @_netg2_kernel(%arg0: memref<2x32xbf16, #tpu.memory_space<vmem>>, %arg1: memref<4x8x2xf32, #tpu.memory_space<vmem>>, %arg2: memref<4x32x64xbf16, #tpu.memory_space<vmem>>, %arg3: memref<4x16x8xf32, #tpu.memory_space<vmem>>, %arg4: memref<4x64x64xbf16, #tpu.memory_space<vmem>>, %arg5: memref<4x32x16xf32, #tpu.memory_space<vmem>>, %arg6: memref<4x64x64xbf16, #tpu.memory_space<vmem>>, %arg7: memref<4x64x32xf32, #tpu.memory_space<vmem>>, %arg8: memref<4x64x96xbf16, #tpu.memory_space<vmem>>, %arg9: memref<64x64xf32, #tpu.memory_space<vmem>>, %arg10: memref<1x64xf32, #tpu.memory_space<vmem>>, %arg11: memref<1x64xf32, #tpu.memory_space<vmem>>, %arg12: memref<64x64xf32, #tpu.memory_space<vmem>>, %arg13: memref<1x64xf32, #tpu.memory_space<vmem>>, %arg14: memref<1x64xf32, #tpu.memory_space<vmem>>, %arg15: memref<64x64xf32, #tpu.memory_space<vmem>>, %arg16: memref<1x64xf32, #tpu.memory_space<vmem>>, %arg17: memref<1x64xf32, #tpu.memory_space<vmem>>, %arg18: memref<128x64xf32, #tpu.memory_space<vmem>>, %arg19: memref<32x64xf32, #tpu.memory_space<vmem>>, %arg20: memref<384x64xf32, #tpu.memory_space<vmem>>) attributes {dimension_semantics = [], scalar_prefetch = 0 : i64, scratch_operands = 0 : i64, tpu.core_type = #tpu.core_type<tc>} {
    %c0 = arith.constant 0 : index
    %c0_0 = arith.constant 0 : index
    %0 = vector.load %arg0[%c0, %c0_0] : memref<2x32xbf16, #tpu.memory_space<vmem>>, vector<2x32xbf16>
    %c0_1 = arith.constant 0 : index
    %c0_2 = arith.constant 0 : index
    %c0_3 = arith.constant 0 : index
    %1 = vector.load %arg2[%c0_1, %c0_2, %c0_3] : memref<4x32x64xbf16, #tpu.memory_space<vmem>>, vector<1x32x64xbf16>
    %2 = vector.shape_cast %1 : vector<1x32x64xbf16> to vector<32x64xbf16>
    %cst = arith.constant dense<0.000000e+00> : vector<2x64xf32>
    %3 = tpu.matmul %0, %2, %cst {dimension_numbers = #tpu.dot_dimension_numbers<[1], [0], [0], [1], [0, 0, 1, 1], [], []>} : vector<2x32xbf16>, vector<32x64xbf16>, vector<2x64xf32> -> vector<2x64xf32>
    %c0_4 = arith.constant 0 : index
    %c0_5 = arith.constant 0 : index
    %c0_6 = arith.constant 0 : index
    %4 = vector.load %arg1[%c0_4, %c0_5, %c0_6] : memref<4x8x2xf32, #tpu.memory_space<vmem>>, vector<1x8x2xf32>
    %5 = vector.shape_cast %4 : vector<1x8x2xf32> to vector<8x2xf32>
    %cst_7 = arith.constant dense<0.000000e+00> : vector<8x64xf32>
    %6 = tpu.matmul %5, %3, %cst_7 {dimension_numbers = #tpu.dot_dimension_numbers<[1], [0], [0], [1], [0, 0, 1, 1], [], []>} : vector<8x2xf32>, vector<2x64xf32>, vector<8x64xf32> -> vector<8x64xf32>
    %c1 = arith.constant 1 : index
    %c0_8 = arith.constant 0 : index
    %c0_9 = arith.constant 0 : index
    %7 = vector.load %arg2[%c1, %c0_8, %c0_9] : memref<4x32x64xbf16, #tpu.memory_space<vmem>>, vector<1x32x64xbf16>
    %8 = vector.shape_cast %7 : vector<1x32x64xbf16> to vector<32x64xbf16>
    %cst_10 = arith.constant dense<0.000000e+00> : vector<2x64xf32>
    %9 = tpu.matmul %0, %8, %cst_10 {dimension_numbers = #tpu.dot_dimension_numbers<[1], [0], [0], [1], [0, 0, 1, 1], [], []>} : vector<2x32xbf16>, vector<32x64xbf16>, vector<2x64xf32> -> vector<2x64xf32>
    %c1_11 = arith.constant 1 : index
    %c0_12 = arith.constant 0 : index
    %c0_13 = arith.constant 0 : index
    %10 = vector.load %arg1[%c1_11, %c0_12, %c0_13] : memref<4x8x2xf32, #tpu.memory_space<vmem>>, vector<1x8x2xf32>
    %11 = vector.shape_cast %10 : vector<1x8x2xf32> to vector<8x2xf32>
    %cst_14 = arith.constant dense<0.000000e+00> : vector<8x64xf32>
    %12 = tpu.matmul %11, %9, %cst_14 {dimension_numbers = #tpu.dot_dimension_numbers<[1], [0], [0], [1], [0, 0, 1, 1], [], []>} : vector<8x2xf32>, vector<2x64xf32>, vector<8x64xf32> -> vector<8x64xf32>
    %13 = arith.addf %6, %12 : vector<8x64xf32>
    %c2 = arith.constant 2 : index
    %c0_15 = arith.constant 0 : index
    %c0_16 = arith.constant 0 : index
    %14 = vector.load %arg2[%c2, %c0_15, %c0_16] : memref<4x32x64xbf16, #tpu.memory_space<vmem>>, vector<1x32x64xbf16>
    %15 = vector.shape_cast %14 : vector<1x32x64xbf16> to vector<32x64xbf16>
    %cst_17 = arith.constant dense<0.000000e+00> : vector<2x64xf32>
    %16 = tpu.matmul %0, %15, %cst_17 {dimension_numbers = #tpu.dot_dimension_numbers<[1], [0], [0], [1], [0, 0, 1, 1], [], []>} : vector<2x32xbf16>, vector<32x64xbf16>, vector<2x64xf32> -> vector<2x64xf32>
    %c2_18 = arith.constant 2 : index
    %c0_19 = arith.constant 0 : index
    %c0_20 = arith.constant 0 : index
    %17 = vector.load %arg1[%c2_18, %c0_19, %c0_20] : memref<4x8x2xf32, #tpu.memory_space<vmem>>, vector<1x8x2xf32>
    %18 = vector.shape_cast %17 : vector<1x8x2xf32> to vector<8x2xf32>
    %cst_21 = arith.constant dense<0.000000e+00> : vector<8x64xf32>
    %19 = tpu.matmul %18, %16, %cst_21 {dimension_numbers = #tpu.dot_dimension_numbers<[1], [0], [0], [1], [0, 0, 1, 1], [], []>} : vector<8x2xf32>, vector<2x64xf32>, vector<8x64xf32> -> vector<8x64xf32>
    %20 = arith.addf %13, %19 : vector<8x64xf32>
    %c3 = arith.constant 3 : index
    %c0_22 = arith.constant 0 : index
    %c0_23 = arith.constant 0 : index
    %21 = vector.load %arg2[%c3, %c0_22, %c0_23] : memref<4x32x64xbf16, #tpu.memory_space<vmem>>, vector<1x32x64xbf16>
    %22 = vector.shape_cast %21 : vector<1x32x64xbf16> to vector<32x64xbf16>
    %cst_24 = arith.constant dense<0.000000e+00> : vector<2x64xf32>
    %23 = tpu.matmul %0, %22, %cst_24 {dimension_numbers = #tpu.dot_dimension_numbers<[1], [0], [0], [1], [0, 0, 1, 1], [], []>} : vector<2x32xbf16>, vector<32x64xbf16>, vector<2x64xf32> -> vector<2x64xf32>
    %c3_25 = arith.constant 3 : index
    %c0_26 = arith.constant 0 : index
    %c0_27 = arith.constant 0 : index
    %24 = vector.load %arg1[%c3_25, %c0_26, %c0_27] : memref<4x8x2xf32, #tpu.memory_space<vmem>>, vector<1x8x2xf32>
    %25 = vector.shape_cast %24 : vector<1x8x2xf32> to vector<8x2xf32>
    %cst_28 = arith.constant dense<0.000000e+00> : vector<8x64xf32>
    %26 = tpu.matmul %25, %23, %cst_28 {dimension_numbers = #tpu.dot_dimension_numbers<[1], [0], [0], [1], [0, 0, 1, 1], [], []>} : vector<8x2xf32>, vector<2x64xf32>, vector<8x64xf32> -> vector<8x64xf32>
    %27 = arith.addf %20, %26 : vector<8x64xf32>
    %cst_29 = arith.constant dense<0.000000e+00> : vector<64xf32>
    %28 = vector.multi_reduction <add>, %27, %cst_29 [0] : vector<8x64xf32> to vector<64xf32>
    %29 = vector.shape_cast %28 : vector<64xf32> to vector<1x64xf32>
    %30 = arith.mulf %27, %27 : vector<8x64xf32>
    %cst_30 = arith.constant dense<0.000000e+00> : vector<64xf32>
    %31 = vector.multi_reduction <add>, %30, %cst_30 [0] : vector<8x64xf32> to vector<64xf32>
    %32 = vector.shape_cast %31 : vector<64xf32> to vector<1x64xf32>
    %c0_31 = arith.constant 0 : index
    %c0_32 = arith.constant 0 : index
    %33 = vector.load %arg9[%c0_31, %c0_32] : memref<64x64xf32, #tpu.memory_space<vmem>>, vector<64x64xf32>
    %cst_33 = arith.constant dense<0.000000e+00> : vector<1x64xf32>
    %34 = tpu.matmul %29, %33, %cst_33 {dimension_numbers = #tpu.dot_dimension_numbers<[1], [0], [0], [1], [0, 0, 1, 1], [], []>} : vector<1x64xf32>, vector<64x64xf32>, vector<1x64xf32> -> vector<1x64xf32>
    %cst_34 = arith.constant 3.125000e-02 : f32
    %35 = vector.broadcast %cst_34 : f32 to vector<1x64xf32>
    %36 = arith.mulf %34, %35 : vector<1x64xf32>
    %c0_35 = arith.constant 0 : index
    %c0_36 = arith.constant 0 : index
    %37 = vector.load %arg9[%c0_35, %c0_36] : memref<64x64xf32, #tpu.memory_space<vmem>>, vector<64x64xf32>
    %cst_37 = arith.constant dense<0.000000e+00> : vector<1x64xf32>
    %38 = tpu.matmul %32, %37, %cst_37 {dimension_numbers = #tpu.dot_dimension_numbers<[1], [0], [0], [1], [0, 0, 1, 1], [], []>} : vector<1x64xf32>, vector<64x64xf32>, vector<1x64xf32> -> vector<1x64xf32>
    %cst_38 = arith.constant 3.125000e-02 : f32
    %39 = vector.broadcast %cst_38 : f32 to vector<1x64xf32>
    %40 = arith.mulf %38, %39 : vector<1x64xf32>
    %41 = arith.mulf %36, %36 : vector<1x64xf32>
    %42 = arith.subf %40, %41 : vector<1x64xf32>
    %c0_39 = arith.constant 0 : index
    %c0_40 = arith.constant 0 : index
    %43 = vector.load %arg10[%c0_39, %c0_40] : memref<1x64xf32, #tpu.memory_space<vmem>>, vector<1x64xf32>
    %cst_41 = arith.constant 9.99999974E-6 : f32
    %44 = vector.broadcast %cst_41 : f32 to vector<1x64xf32>
    %45 = arith.addf %42, %44 : vector<1x64xf32>
    %46 = math.rsqrt %45 : vector<1x64xf32>
    %47 = arith.mulf %43, %46 : vector<1x64xf32>
    %c0_42 = arith.constant 0 : index
    %c0_43 = arith.constant 0 : index
    %48 = vector.load %arg11[%c0_42, %c0_43] : memref<1x64xf32, #tpu.memory_space<vmem>>, vector<1x64xf32>
    %49 = arith.mulf %36, %47 : vector<1x64xf32>
    %50 = arith.subf %48, %49 : vector<1x64xf32>
    %51 = vector.broadcast %47 : vector<1x64xf32> to vector<8x64xf32>
    %52 = arith.mulf %27, %51 : vector<8x64xf32>
    %53 = vector.broadcast %50 : vector<1x64xf32> to vector<8x64xf32>
    %54 = arith.addf %52, %53 : vector<8x64xf32>
    %cst_44 = arith.constant 0.000000e+00 : f32
    %55 = vector.broadcast %cst_44 : f32 to vector<8x64xf32>
    %56 = arith.maximumf %54, %55 : vector<8x64xf32>
    %57 = arith.truncf %56 : vector<8x64xf32> to vector<8x64xbf16>
    %c0_45 = arith.constant 0 : index
    %c0_46 = arith.constant 0 : index
    %c0_47 = arith.constant 0 : index
    %58 = vector.load %arg4[%c0_45, %c0_46, %c0_47] : memref<4x64x64xbf16, #tpu.memory_space<vmem>>, vector<1x64x64xbf16>
    %59 = vector.shape_cast %58 : vector<1x64x64xbf16> to vector<64x64xbf16>
    %cst_48 = arith.constant dense<0.000000e+00> : vector<8x64xf32>
    %60 = tpu.matmul %57, %59, %cst_48 {dimension_numbers = #tpu.dot_dimension_numbers<[1], [0], [0], [1], [0, 0, 1, 1], [], []>} : vector<8x64xbf16>, vector<64x64xbf16>, vector<8x64xf32> -> vector<8x64xf32>
    %c0_49 = arith.constant 0 : index
    %c0_50 = arith.constant 0 : index
    %c0_51 = arith.constant 0 : index
    %61 = vector.load %arg3[%c0_49, %c0_50, %c0_51] : memref<4x16x8xf32, #tpu.memory_space<vmem>>, vector<1x16x8xf32>
    %62 = vector.shape_cast %61 : vector<1x16x8xf32> to vector<16x8xf32>
    %cst_52 = arith.constant dense<0.000000e+00> : vector<16x64xf32>
    %63 = tpu.matmul %62, %60, %cst_52 {dimension_numbers = #tpu.dot_dimension_numbers<[1], [0], [0], [1], [0, 0, 1, 1], [], []>} : vector<16x8xf32>, vector<8x64xf32>, vector<16x64xf32> -> vector<16x64xf32>
    %c1_53 = arith.constant 1 : index
    %c0_54 = arith.constant 0 : index
    %c0_55 = arith.constant 0 : index
    %64 = vector.load %arg4[%c1_53, %c0_54, %c0_55] : memref<4x64x64xbf16, #tpu.memory_space<vmem>>, vector<1x64x64xbf16>
    %65 = vector.shape_cast %64 : vector<1x64x64xbf16> to vector<64x64xbf16>
    %cst_56 = arith.constant dense<0.000000e+00> : vector<8x64xf32>
    %66 = tpu.matmul %57, %65, %cst_56 {dimension_numbers = #tpu.dot_dimension_numbers<[1], [0], [0], [1], [0, 0, 1, 1], [], []>} : vector<8x64xbf16>, vector<64x64xbf16>, vector<8x64xf32> -> vector<8x64xf32>
    %c1_57 = arith.constant 1 : index
    %c0_58 = arith.constant 0 : index
    %c0_59 = arith.constant 0 : index
    %67 = vector.load %arg3[%c1_57, %c0_58, %c0_59] : memref<4x16x8xf32, #tpu.memory_space<vmem>>, vector<1x16x8xf32>
    %68 = vector.shape_cast %67 : vector<1x16x8xf32> to vector<16x8xf32>
    %cst_60 = arith.constant dense<0.000000e+00> : vector<16x64xf32>
    %69 = tpu.matmul %68, %66, %cst_60 {dimension_numbers = #tpu.dot_dimension_numbers<[1], [0], [0], [1], [0, 0, 1, 1], [], []>} : vector<16x8xf32>, vector<8x64xf32>, vector<16x64xf32> -> vector<16x64xf32>
    %70 = arith.addf %63, %69 : vector<16x64xf32>
    %c2_61 = arith.constant 2 : index
    %c0_62 = arith.constant 0 : index
    %c0_63 = arith.constant 0 : index
    %71 = vector.load %arg4[%c2_61, %c0_62, %c0_63] : memref<4x64x64xbf16, #tpu.memory_space<vmem>>, vector<1x64x64xbf16>
    %72 = vector.shape_cast %71 : vector<1x64x64xbf16> to vector<64x64xbf16>
    %cst_64 = arith.constant dense<0.000000e+00> : vector<8x64xf32>
    %73 = tpu.matmul %57, %72, %cst_64 {dimension_numbers = #tpu.dot_dimension_numbers<[1], [0], [0], [1], [0, 0, 1, 1], [], []>} : vector<8x64xbf16>, vector<64x64xbf16>, vector<8x64xf32> -> vector<8x64xf32>
    %c2_65 = arith.constant 2 : index
    %c0_66 = arith.constant 0 : index
    %c0_67 = arith.constant 0 : index
    %74 = vector.load %arg3[%c2_65, %c0_66, %c0_67] : memref<4x16x8xf32, #tpu.memory_space<vmem>>, vector<1x16x8xf32>
    %75 = vector.shape_cast %74 : vector<1x16x8xf32> to vector<16x8xf32>
    %cst_68 = arith.constant dense<0.000000e+00> : vector<16x64xf32>
    %76 = tpu.matmul %75, %73, %cst_68 {dimension_numbers = #tpu.dot_dimension_numbers<[1], [0], [0], [1], [0, 0, 1, 1], [], []>} : vector<16x8xf32>, vector<8x64xf32>, vector<16x64xf32> -> vector<16x64xf32>
    %77 = arith.addf %70, %76 : vector<16x64xf32>
    %c3_69 = arith.constant 3 : index
    %c0_70 = arith.constant 0 : index
    %c0_71 = arith.constant 0 : index
    %78 = vector.load %arg4[%c3_69, %c0_70, %c0_71] : memref<4x64x64xbf16, #tpu.memory_space<vmem>>, vector<1x64x64xbf16>
    %79 = vector.shape_cast %78 : vector<1x64x64xbf16> to vector<64x64xbf16>
    %cst_72 = arith.constant dense<0.000000e+00> : vector<8x64xf32>
    %80 = tpu.matmul %57, %79, %cst_72 {dimension_numbers = #tpu.dot_dimension_numbers<[1], [0], [0], [1], [0, 0, 1, 1], [], []>} : vector<8x64xbf16>, vector<64x64xbf16>, vector<8x64xf32> -> vector<8x64xf32>
    %c3_73 = arith.constant 3 : index
    %c0_74 = arith.constant 0 : index
    %c0_75 = arith.constant 0 : index
    %81 = vector.load %arg3[%c3_73, %c0_74, %c0_75] : memref<4x16x8xf32, #tpu.memory_space<vmem>>, vector<1x16x8xf32>
    %82 = vector.shape_cast %81 : vector<1x16x8xf32> to vector<16x8xf32>
    %cst_76 = arith.constant dense<0.000000e+00> : vector<16x64xf32>
    %83 = tpu.matmul %82, %80, %cst_76 {dimension_numbers = #tpu.dot_dimension_numbers<[1], [0], [0], [1], [0, 0, 1, 1], [], []>} : vector<16x8xf32>, vector<8x64xf32>, vector<16x64xf32> -> vector<16x64xf32>
    %84 = arith.addf %77, %83 : vector<16x64xf32>
    %cst_77 = arith.constant dense<0.000000e+00> : vector<64xf32>
    %85 = vector.multi_reduction <add>, %84, %cst_77 [0] : vector<16x64xf32> to vector<64xf32>
    %86 = vector.shape_cast %85 : vector<64xf32> to vector<1x64xf32>
    %87 = arith.mulf %84, %84 : vector<16x64xf32>
    %cst_78 = arith.constant dense<0.000000e+00> : vector<64xf32>
    %88 = vector.multi_reduction <add>, %87, %cst_78 [0] : vector<16x64xf32> to vector<64xf32>
    %89 = vector.shape_cast %88 : vector<64xf32> to vector<1x64xf32>
    %c0_79 = arith.constant 0 : index
    %c0_80 = arith.constant 0 : index
    %90 = vector.load %arg12[%c0_79, %c0_80] : memref<64x64xf32, #tpu.memory_space<vmem>>, vector<64x64xf32>
    %cst_81 = arith.constant dense<0.000000e+00> : vector<1x64xf32>
    %91 = tpu.matmul %86, %90, %cst_81 {dimension_numbers = #tpu.dot_dimension_numbers<[1], [0], [0], [1], [0, 0, 1, 1], [], []>} : vector<1x64xf32>, vector<64x64xf32>, vector<1x64xf32> -> vector<1x64xf32>
    %cst_82 = arith.constant 7.812500e-03 : f32
    %92 = vector.broadcast %cst_82 : f32 to vector<1x64xf32>
    %93 = arith.mulf %91, %92 : vector<1x64xf32>
    %c0_83 = arith.constant 0 : index
    %c0_84 = arith.constant 0 : index
    %94 = vector.load %arg12[%c0_83, %c0_84] : memref<64x64xf32, #tpu.memory_space<vmem>>, vector<64x64xf32>
    %cst_85 = arith.constant dense<0.000000e+00> : vector<1x64xf32>
    %95 = tpu.matmul %89, %94, %cst_85 {dimension_numbers = #tpu.dot_dimension_numbers<[1], [0], [0], [1], [0, 0, 1, 1], [], []>} : vector<1x64xf32>, vector<64x64xf32>, vector<1x64xf32> -> vector<1x64xf32>
    %cst_86 = arith.constant 7.812500e-03 : f32
    %96 = vector.broadcast %cst_86 : f32 to vector<1x64xf32>
    %97 = arith.mulf %95, %96 : vector<1x64xf32>
    %98 = arith.mulf %93, %93 : vector<1x64xf32>
    %99 = arith.subf %97, %98 : vector<1x64xf32>
    %c0_87 = arith.constant 0 : index
    %c0_88 = arith.constant 0 : index
    %100 = vector.load %arg13[%c0_87, %c0_88] : memref<1x64xf32, #tpu.memory_space<vmem>>, vector<1x64xf32>
    %cst_89 = arith.constant 9.99999974E-6 : f32
    %101 = vector.broadcast %cst_89 : f32 to vector<1x64xf32>
    %102 = arith.addf %99, %101 : vector<1x64xf32>
    %103 = math.rsqrt %102 : vector<1x64xf32>
    %104 = arith.mulf %100, %103 : vector<1x64xf32>
    %c0_90 = arith.constant 0 : index
    %c0_91 = arith.constant 0 : index
    %105 = vector.load %arg14[%c0_90, %c0_91] : memref<1x64xf32, #tpu.memory_space<vmem>>, vector<1x64xf32>
    %106 = arith.mulf %93, %104 : vector<1x64xf32>
    %107 = arith.subf %105, %106 : vector<1x64xf32>
    %108 = vector.broadcast %104 : vector<1x64xf32> to vector<16x64xf32>
    %109 = arith.mulf %84, %108 : vector<16x64xf32>
    %110 = vector.broadcast %107 : vector<1x64xf32> to vector<16x64xf32>
    %111 = arith.addf %109, %110 : vector<16x64xf32>
    %cst_92 = arith.constant 0.000000e+00 : f32
    %112 = vector.broadcast %cst_92 : f32 to vector<16x64xf32>
    %113 = arith.maximumf %111, %112 : vector<16x64xf32>
    %114 = arith.truncf %113 : vector<16x64xf32> to vector<16x64xbf16>
    %c0_93 = arith.constant 0 : index
    %c0_94 = arith.constant 0 : index
    %c0_95 = arith.constant 0 : index
    %115 = vector.load %arg6[%c0_93, %c0_94, %c0_95] : memref<4x64x64xbf16, #tpu.memory_space<vmem>>, vector<1x64x64xbf16>
    %116 = vector.shape_cast %115 : vector<1x64x64xbf16> to vector<64x64xbf16>
    %cst_96 = arith.constant dense<0.000000e+00> : vector<16x64xf32>
    %117 = tpu.matmul %114, %116, %cst_96 {dimension_numbers = #tpu.dot_dimension_numbers<[1], [0], [0], [1], [0, 0, 1, 1], [], []>} : vector<16x64xbf16>, vector<64x64xbf16>, vector<16x64xf32> -> vector<16x64xf32>
    %c0_97 = arith.constant 0 : index
    %c0_98 = arith.constant 0 : index
    %c0_99 = arith.constant 0 : index
    %118 = vector.load %arg5[%c0_97, %c0_98, %c0_99] : memref<4x32x16xf32, #tpu.memory_space<vmem>>, vector<1x32x16xf32>
    %119 = vector.shape_cast %118 : vector<1x32x16xf32> to vector<32x16xf32>
    %cst_100 = arith.constant dense<0.000000e+00> : vector<32x64xf32>
    %120 = tpu.matmul %119, %117, %cst_100 {dimension_numbers = #tpu.dot_dimension_numbers<[1], [0], [0], [1], [0, 0, 1, 1], [], []>} : vector<32x16xf32>, vector<16x64xf32>, vector<32x64xf32> -> vector<32x64xf32>
    %c1_101 = arith.constant 1 : index
    %c0_102 = arith.constant 0 : index
    %c0_103 = arith.constant 0 : index
    %121 = vector.load %arg6[%c1_101, %c0_102, %c0_103] : memref<4x64x64xbf16, #tpu.memory_space<vmem>>, vector<1x64x64xbf16>
    %122 = vector.shape_cast %121 : vector<1x64x64xbf16> to vector<64x64xbf16>
    %cst_104 = arith.constant dense<0.000000e+00> : vector<16x64xf32>
    %123 = tpu.matmul %114, %122, %cst_104 {dimension_numbers = #tpu.dot_dimension_numbers<[1], [0], [0], [1], [0, 0, 1, 1], [], []>} : vector<16x64xbf16>, vector<64x64xbf16>, vector<16x64xf32> -> vector<16x64xf32>
    %c1_105 = arith.constant 1 : index
    %c0_106 = arith.constant 0 : index
    %c0_107 = arith.constant 0 : index
    %124 = vector.load %arg5[%c1_105, %c0_106, %c0_107] : memref<4x32x16xf32, #tpu.memory_space<vmem>>, vector<1x32x16xf32>
    %125 = vector.shape_cast %124 : vector<1x32x16xf32> to vector<32x16xf32>
    %cst_108 = arith.constant dense<0.000000e+00> : vector<32x64xf32>
    %126 = tpu.matmul %125, %123, %cst_108 {dimension_numbers = #tpu.dot_dimension_numbers<[1], [0], [0], [1], [0, 0, 1, 1], [], []>} : vector<32x16xf32>, vector<16x64xf32>, vector<32x64xf32> -> vector<32x64xf32>
    %127 = arith.addf %120, %126 : vector<32x64xf32>
    %c2_109 = arith.constant 2 : index
    %c0_110 = arith.constant 0 : index
    %c0_111 = arith.constant 0 : index
    %128 = vector.load %arg6[%c2_109, %c0_110, %c0_111] : memref<4x64x64xbf16, #tpu.memory_space<vmem>>, vector<1x64x64xbf16>
    %129 = vector.shape_cast %128 : vector<1x64x64xbf16> to vector<64x64xbf16>
    %cst_112 = arith.constant dense<0.000000e+00> : vector<16x64xf32>
    %130 = tpu.matmul %114, %129, %cst_112 {dimension_numbers = #tpu.dot_dimension_numbers<[1], [0], [0], [1], [0, 0, 1, 1], [], []>} : vector<16x64xbf16>, vector<64x64xbf16>, vector<16x64xf32> -> vector<16x64xf32>
    %c2_113 = arith.constant 2 : index
    %c0_114 = arith.constant 0 : index
    %c0_115 = arith.constant 0 : index
    %131 = vector.load %arg5[%c2_113, %c0_114, %c0_115] : memref<4x32x16xf32, #tpu.memory_space<vmem>>, vector<1x32x16xf32>
    %132 = vector.shape_cast %131 : vector<1x32x16xf32> to vector<32x16xf32>
    %cst_116 = arith.constant dense<0.000000e+00> : vector<32x64xf32>
    %133 = tpu.matmul %132, %130, %cst_116 {dimension_numbers = #tpu.dot_dimension_numbers<[1], [0], [0], [1], [0, 0, 1, 1], [], []>} : vector<32x16xf32>, vector<16x64xf32>, vector<32x64xf32> -> vector<32x64xf32>
    %134 = arith.addf %127, %133 : vector<32x64xf32>
    %c3_117 = arith.constant 3 : index
    %c0_118 = arith.constant 0 : index
    %c0_119 = arith.constant 0 : index
    %135 = vector.load %arg6[%c3_117, %c0_118, %c0_119] : memref<4x64x64xbf16, #tpu.memory_space<vmem>>, vector<1x64x64xbf16>
    %136 = vector.shape_cast %135 : vector<1x64x64xbf16> to vector<64x64xbf16>
    %cst_120 = arith.constant dense<0.000000e+00> : vector<16x64xf32>
    %137 = tpu.matmul %114, %136, %cst_120 {dimension_numbers = #tpu.dot_dimension_numbers<[1], [0], [0], [1], [0, 0, 1, 1], [], []>} : vector<16x64xbf16>, vector<64x64xbf16>, vector<16x64xf32> -> vector<16x64xf32>
    %c3_121 = arith.constant 3 : index
    %c0_122 = arith.constant 0 : index
    %c0_123 = arith.constant 0 : index
    %138 = vector.load %arg5[%c3_121, %c0_122, %c0_123] : memref<4x32x16xf32, #tpu.memory_space<vmem>>, vector<1x32x16xf32>
    %139 = vector.shape_cast %138 : vector<1x32x16xf32> to vector<32x16xf32>
    %cst_124 = arith.constant dense<0.000000e+00> : vector<32x64xf32>
    %140 = tpu.matmul %139, %137, %cst_124 {dimension_numbers = #tpu.dot_dimension_numbers<[1], [0], [0], [1], [0, 0, 1, 1], [], []>} : vector<32x16xf32>, vector<16x64xf32>, vector<32x64xf32> -> vector<32x64xf32>
    %141 = arith.addf %134, %140 : vector<32x64xf32>
    %cst_125 = arith.constant dense<0.000000e+00> : vector<64xf32>
    %142 = vector.multi_reduction <add>, %141, %cst_125 [0] : vector<32x64xf32> to vector<64xf32>
    %143 = vector.shape_cast %142 : vector<64xf32> to vector<1x64xf32>
    %144 = arith.mulf %141, %141 : vector<32x64xf32>
    %cst_126 = arith.constant dense<0.000000e+00> : vector<64xf32>
    %145 = vector.multi_reduction <add>, %144, %cst_126 [0] : vector<32x64xf32> to vector<64xf32>
    %146 = vector.shape_cast %145 : vector<64xf32> to vector<1x64xf32>
    %c0_127 = arith.constant 0 : index
    %c0_128 = arith.constant 0 : index
    %147 = vector.load %arg15[%c0_127, %c0_128] : memref<64x64xf32, #tpu.memory_space<vmem>>, vector<64x64xf32>
    %cst_129 = arith.constant dense<0.000000e+00> : vector<1x64xf32>
    %148 = tpu.matmul %143, %147, %cst_129 {dimension_numbers = #tpu.dot_dimension_numbers<[1], [0], [0], [1], [0, 0, 1, 1], [], []>} : vector<1x64xf32>, vector<64x64xf32>, vector<1x64xf32> -> vector<1x64xf32>
    %cst_130 = arith.constant 0.001953125 : f32
    %149 = vector.broadcast %cst_130 : f32 to vector<1x64xf32>
    %150 = arith.mulf %148, %149 : vector<1x64xf32>
    %c0_131 = arith.constant 0 : index
    %c0_132 = arith.constant 0 : index
    %151 = vector.load %arg15[%c0_131, %c0_132] : memref<64x64xf32, #tpu.memory_space<vmem>>, vector<64x64xf32>
    %cst_133 = arith.constant dense<0.000000e+00> : vector<1x64xf32>
    %152 = tpu.matmul %146, %151, %cst_133 {dimension_numbers = #tpu.dot_dimension_numbers<[1], [0], [0], [1], [0, 0, 1, 1], [], []>} : vector<1x64xf32>, vector<64x64xf32>, vector<1x64xf32> -> vector<1x64xf32>
    %cst_134 = arith.constant 0.001953125 : f32
    %153 = vector.broadcast %cst_134 : f32 to vector<1x64xf32>
    %154 = arith.mulf %152, %153 : vector<1x64xf32>
    %155 = arith.mulf %150, %150 : vector<1x64xf32>
    %156 = arith.subf %154, %155 : vector<1x64xf32>
    %c0_135 = arith.constant 0 : index
    %c0_136 = arith.constant 0 : index
    %157 = vector.load %arg16[%c0_135, %c0_136] : memref<1x64xf32, #tpu.memory_space<vmem>>, vector<1x64xf32>
    %cst_137 = arith.constant 9.99999974E-6 : f32
    %158 = vector.broadcast %cst_137 : f32 to vector<1x64xf32>
    %159 = arith.addf %156, %158 : vector<1x64xf32>
    %160 = math.rsqrt %159 : vector<1x64xf32>
    %161 = arith.mulf %157, %160 : vector<1x64xf32>
    %c0_138 = arith.constant 0 : index
    %c0_139 = arith.constant 0 : index
    %162 = vector.load %arg17[%c0_138, %c0_139] : memref<1x64xf32, #tpu.memory_space<vmem>>, vector<1x64xf32>
    %163 = arith.mulf %150, %161 : vector<1x64xf32>
    %164 = arith.subf %162, %163 : vector<1x64xf32>
    %165 = vector.broadcast %161 : vector<1x64xf32> to vector<32x64xf32>
    %166 = arith.mulf %141, %165 : vector<32x64xf32>
    %167 = vector.broadcast %164 : vector<1x64xf32> to vector<32x64xf32>
    %168 = arith.addf %166, %167 : vector<32x64xf32>
    %cst_140 = arith.constant 0.000000e+00 : f32
    %169 = vector.broadcast %cst_140 : f32 to vector<32x64xf32>
    %170 = arith.maximumf %168, %169 : vector<32x64xf32>
    %171 = arith.truncf %170 : vector<32x64xf32> to vector<32x64xbf16>
    %c0_141 = arith.constant 0 : index
    %c0_142 = arith.constant 0 : index
    %c0_143 = arith.constant 0 : index
    %172 = vector.load %arg8[%c0_141, %c0_142, %c0_143] : memref<4x64x96xbf16, #tpu.memory_space<vmem>>, vector<1x64x96xbf16>
    %173 = vector.shape_cast %172 : vector<1x64x96xbf16> to vector<64x96xbf16>
    %cst_144 = arith.constant dense<0.000000e+00> : vector<32x96xf32>
    %174 = tpu.matmul %171, %173, %cst_144 {dimension_numbers = #tpu.dot_dimension_numbers<[1], [0], [0], [1], [0, 0, 1, 1], [], []>} : vector<32x64xbf16>, vector<64x96xbf16>, vector<32x96xf32> -> vector<32x96xf32>
    %c0_145 = arith.constant 0 : index
    %c0_146 = arith.constant 0 : index
    %c0_147 = arith.constant 0 : index
    %175 = vector.load %arg7[%c0_145, %c0_146, %c0_147] : memref<4x64x32xf32, #tpu.memory_space<vmem>>, vector<1x64x32xf32>
    %176 = vector.shape_cast %175 : vector<1x64x32xf32> to vector<64x32xf32>
    %cst_148 = arith.constant dense<0.000000e+00> : vector<64x96xf32>
    %177 = tpu.matmul %176, %174, %cst_148 {dimension_numbers = #tpu.dot_dimension_numbers<[1], [0], [0], [1], [0, 0, 1, 1], [], []>} : vector<64x32xf32>, vector<32x96xf32>, vector<64x96xf32> -> vector<64x96xf32>
    %c1_149 = arith.constant 1 : index
    %c0_150 = arith.constant 0 : index
    %c0_151 = arith.constant 0 : index
    %178 = vector.load %arg8[%c1_149, %c0_150, %c0_151] : memref<4x64x96xbf16, #tpu.memory_space<vmem>>, vector<1x64x96xbf16>
    %179 = vector.shape_cast %178 : vector<1x64x96xbf16> to vector<64x96xbf16>
    %cst_152 = arith.constant dense<0.000000e+00> : vector<32x96xf32>
    %180 = tpu.matmul %171, %179, %cst_152 {dimension_numbers = #tpu.dot_dimension_numbers<[1], [0], [0], [1], [0, 0, 1, 1], [], []>} : vector<32x64xbf16>, vector<64x96xbf16>, vector<32x96xf32> -> vector<32x96xf32>
    %c1_153 = arith.constant 1 : index
    %c0_154 = arith.constant 0 : index
    %c0_155 = arith.constant 0 : index
    %181 = vector.load %arg7[%c1_153, %c0_154, %c0_155] : memref<4x64x32xf32, #tpu.memory_space<vmem>>, vector<1x64x32xf32>
    %182 = vector.shape_cast %181 : vector<1x64x32xf32> to vector<64x32xf32>
    %cst_156 = arith.constant dense<0.000000e+00> : vector<64x96xf32>
    %183 = tpu.matmul %182, %180, %cst_156 {dimension_numbers = #tpu.dot_dimension_numbers<[1], [0], [0], [1], [0, 0, 1, 1], [], []>} : vector<64x32xf32>, vector<32x96xf32>, vector<64x96xf32> -> vector<64x96xf32>
    %184 = arith.addf %177, %183 : vector<64x96xf32>
    %c2_157 = arith.constant 2 : index
    %c0_158 = arith.constant 0 : index
    %c0_159 = arith.constant 0 : index
    %185 = vector.load %arg8[%c2_157, %c0_158, %c0_159] : memref<4x64x96xbf16, #tpu.memory_space<vmem>>, vector<1x64x96xbf16>
    %186 = vector.shape_cast %185 : vector<1x64x96xbf16> to vector<64x96xbf16>
    %cst_160 = arith.constant dense<0.000000e+00> : vector<32x96xf32>
    %187 = tpu.matmul %171, %186, %cst_160 {dimension_numbers = #tpu.dot_dimension_numbers<[1], [0], [0], [1], [0, 0, 1, 1], [], []>} : vector<32x64xbf16>, vector<64x96xbf16>, vector<32x96xf32> -> vector<32x96xf32>
    %c2_161 = arith.constant 2 : index
    %c0_162 = arith.constant 0 : index
    %c0_163 = arith.constant 0 : index
    %188 = vector.load %arg7[%c2_161, %c0_162, %c0_163] : memref<4x64x32xf32, #tpu.memory_space<vmem>>, vector<1x64x32xf32>
    %189 = vector.shape_cast %188 : vector<1x64x32xf32> to vector<64x32xf32>
    %cst_164 = arith.constant dense<0.000000e+00> : vector<64x96xf32>
    %190 = tpu.matmul %189, %187, %cst_164 {dimension_numbers = #tpu.dot_dimension_numbers<[1], [0], [0], [1], [0, 0, 1, 1], [], []>} : vector<64x32xf32>, vector<32x96xf32>, vector<64x96xf32> -> vector<64x96xf32>
    %191 = arith.addf %184, %190 : vector<64x96xf32>
    %c3_165 = arith.constant 3 : index
    %c0_166 = arith.constant 0 : index
    %c0_167 = arith.constant 0 : index
    %192 = vector.load %arg8[%c3_165, %c0_166, %c0_167] : memref<4x64x96xbf16, #tpu.memory_space<vmem>>, vector<1x64x96xbf16>
    %193 = vector.shape_cast %192 : vector<1x64x96xbf16> to vector<64x96xbf16>
    %cst_168 = arith.constant dense<0.000000e+00> : vector<32x96xf32>
    %194 = tpu.matmul %171, %193, %cst_168 {dimension_numbers = #tpu.dot_dimension_numbers<[1], [0], [0], [1], [0, 0, 1, 1], [], []>} : vector<32x64xbf16>, vector<64x96xbf16>, vector<32x96xf32> -> vector<32x96xf32>
    %c3_169 = arith.constant 3 : index
    %c0_170 = arith.constant 0 : index
    %c0_171 = arith.constant 0 : index
    %195 = vector.load %arg7[%c3_169, %c0_170, %c0_171] : memref<4x64x32xf32, #tpu.memory_space<vmem>>, vector<1x64x32xf32>
    %196 = vector.shape_cast %195 : vector<1x64x32xf32> to vector<64x32xf32>
    %cst_172 = arith.constant dense<0.000000e+00> : vector<64x96xf32>
    %197 = tpu.matmul %196, %194, %cst_172 {dimension_numbers = #tpu.dot_dimension_numbers<[1], [0], [0], [1], [0, 0, 1, 1], [], []>} : vector<64x32xf32>, vector<32x96xf32>, vector<64x96xf32> -> vector<64x96xf32>
    %198 = arith.addf %191, %197 : vector<64x96xf32>
    %199 = math.tanh %198 : vector<64x96xf32>
    %c0_173 = arith.constant 0 : index
    %c0_174 = arith.constant 0 : index
    %200 = vector.load %arg18[%c0_173, %c0_174] : memref<128x64xf32, #tpu.memory_space<vmem>>, vector<128x64xf32>
    %cst_175 = arith.constant dense<0.000000e+00> : vector<128x96xf32>
    %201 = tpu.matmul %200, %199, %cst_175 {dimension_numbers = #tpu.dot_dimension_numbers<[1], [0], [0], [1], [0, 0, 1, 1], [], []>} : vector<128x64xf32>, vector<64x96xf32>, vector<128x96xf32> -> vector<128x96xf32>
    %202 = vector.extract_strided_slice %201 {offsets = [0, 0], sizes = [128, 32], strides = [1, 1]} : vector<128x96xf32> to vector<128x32xf32>
    %c0_176 = arith.constant 0 : index
    %c0_177 = arith.constant 0 : index
    %203 = vector.load %arg19[%c0_176, %c0_177] : memref<32x64xf32, #tpu.memory_space<vmem>>, vector<32x64xf32>
    %cst_178 = arith.constant dense<0.000000e+00> : vector<128x64xf32>
    %204 = tpu.matmul %202, %203, %cst_178 {dimension_numbers = #tpu.dot_dimension_numbers<[1], [0], [0], [1], [0, 0, 1, 1], [], []>} : vector<128x32xf32>, vector<32x64xf32>, vector<128x64xf32> -> vector<128x64xf32>
    %205 = vector.extract_strided_slice %204 {offsets = [0, 0], sizes = [64, 64], strides = [1, 1]} : vector<128x64xf32> to vector<64x64xf32>
    %c0_179 = arith.constant 0 : index
    %c0_180 = arith.constant 0 : index
    %206 = vector.load %arg20[%c0_179, %c0_180] : memref<384x64xf32, #tpu.memory_space<vmem>>, vector<64x64xf32>
    tpu.vector_store %arg20[%c0_179, %c0_180], %205 {strides = array<i32>} : memref<384x64xf32, #tpu.memory_space<vmem>>, vector<64x64xf32>,
    %207 = vector.extract_strided_slice %204 {offsets = [64, 0], sizes = [64, 64], strides = [1, 1]} : vector<128x64xf32> to vector<64x64xf32>
    %c192 = arith.constant 192 : index
    %c0_181 = arith.constant 0 : index
    %208 = vector.load %arg20[%c192, %c0_181] : memref<384x64xf32, #tpu.memory_space<vmem>>, vector<64x64xf32>
    tpu.vector_store %arg20[%c192, %c0_181], %207 {strides = array<i32>} : memref<384x64xf32, #tpu.memory_space<vmem>>, vector<64x64xf32>,
    %209 = vector.extract_strided_slice %201 {offsets = [0, 32], sizes = [128, 32], strides = [1, 1]} : vector<128x96xf32> to vector<128x32xf32>
    %c0_182 = arith.constant 0 : index
    %c0_183 = arith.constant 0 : index
    %210 = vector.load %arg19[%c0_182, %c0_183] : memref<32x64xf32, #tpu.memory_space<vmem>>, vector<32x64xf32>
    %cst_184 = arith.constant dense<0.000000e+00> : vector<128x64xf32>
    %211 = tpu.matmul %209, %210, %cst_184 {dimension_numbers = #tpu.dot_dimension_numbers<[1], [0], [0], [1], [0, 0, 1, 1], [], []>} : vector<128x32xf32>, vector<32x64xf32>, vector<128x64xf32> -> vector<128x64xf32>
    %212 = vector.extract_strided_slice %211 {offsets = [0, 0], sizes = [64, 64], strides = [1, 1]} : vector<128x64xf32> to vector<64x64xf32>
    %c64 = arith.constant 64 : index
    %c0_185 = arith.constant 0 : index
    %213 = vector.load %arg20[%c64, %c0_185] : memref<384x64xf32, #tpu.memory_space<vmem>>, vector<64x64xf32>
    tpu.vector_store %arg20[%c64, %c0_185], %212 {strides = array<i32>} : memref<384x64xf32, #tpu.memory_space<vmem>>, vector<64x64xf32>,
    %214 = vector.extract_strided_slice %211 {offsets = [64, 0], sizes = [64, 64], strides = [1, 1]} : vector<128x64xf32> to vector<64x64xf32>
    %c256 = arith.constant 256 : index
    %c0_186 = arith.constant 0 : index
    %215 = vector.load %arg20[%c256, %c0_186] : memref<384x64xf32, #tpu.memory_space<vmem>>, vector<64x64xf32>
    tpu.vector_store %arg20[%c256, %c0_186], %214 {strides = array<i32>} : memref<384x64xf32, #tpu.memory_space<vmem>>, vector<64x64xf32>,
    %216 = vector.extract_strided_slice %201 {offsets = [0, 64], sizes = [128, 32], strides = [1, 1]} : vector<128x96xf32> to vector<128x32xf32>
    %c0_187 = arith.constant 0 : index
    %c0_188 = arith.constant 0 : index
    %217 = vector.load %arg19[%c0_187, %c0_188] : memref<32x64xf32, #tpu.memory_space<vmem>>, vector<32x64xf32>
    %cst_189 = arith.constant dense<0.000000e+00> : vector<128x64xf32>
    %218 = tpu.matmul %216, %217, %cst_189 {dimension_numbers = #tpu.dot_dimension_numbers<[1], [0], [0], [1], [0, 0, 1, 1], [], []>} : vector<128x32xf32>, vector<32x64xf32>, vector<128x64xf32> -> vector<128x64xf32>
    %219 = vector.extract_strided_slice %218 {offsets = [0, 0], sizes = [64, 64], strides = [1, 1]} : vector<128x64xf32> to vector<64x64xf32>
    %c128 = arith.constant 128 : index
    %c0_190 = arith.constant 0 : index
    %220 = vector.load %arg20[%c128, %c0_190] : memref<384x64xf32, #tpu.memory_space<vmem>>, vector<64x64xf32>
    tpu.vector_store %arg20[%c128, %c0_190], %219 {strides = array<i32>} : memref<384x64xf32, #tpu.memory_space<vmem>>, vector<64x64xf32>,
    %221 = vector.extract_strided_slice %218 {offsets = [64, 0], sizes = [64, 64], strides = [1, 1]} : vector<128x64xf32> to vector<64x64xf32>
    %c320 = arith.constant 320 : index
    %c0_191 = arith.constant 0 : index
    %222 = vector.load %arg20[%c320, %c0_191] : memref<384x64xf32, #tpu.memory_space<vmem>>, vector<64x64xf32>
    tpu.vector_store %arg20[%c320, %c0_191], %221 {strides = array<i32>} : memref<384x64xf32, #tpu.memory_space<vmem>>, vector<64x64xf32>,
    return
  }
}

</mosaic_0001>

<bundles_post_ra>
// kernel: netg2_forward.1
= control target key start
LH: loop header
LB: loop body
LE: loop exit
PB: predicated region body
PF: predicated region fallthrough
CT: control target
= control target key end

     0   :  { %s7272_s0 = inlined_call_operand.vmem [shape: bf16[2,32], index: 0, kind: input, shape index: {}]   ;;  %s7273_s1 = inlined_call_operand.vmem [shape: f32[4,8,2], index: 1, kind: input, shape index: {}]   ;;  %s7274_s2 = inlined_call_operand.vmem [shape: bf16[4,32,64], index: 2, kind: input, shape index: {}]   ;;  %s7275_s3 = inlined_call_operand.vmem [shape: f32[4,16,8], index: 3, kind: input, shape index: {}]   ;;  %s7276_s4 = inlined_call_operand.vmem [shape: bf16[4,64,64], index: 4, kind: input, shape index: {}]   ;;  %s7277_s5 = inlined_call_operand.vmem [shape: f32[4,32,16], index: 5, kind: input, shape index: {}]   ;;  %s7278_s6 = inlined_call_operand.vmem [shape: bf16[4,64,64], index: 6, kind: input, shape index: {}]   ;;  %s7279_s7 = inlined_call_operand.vmem [shape: f32[4,64,32], index: 7, kind: input, shape index: {}]   ;;  %s7280_s8 = inlined_call_operand.vmem [shape: bf16[4,64,96], index: 8, kind: input, shape index: {}]   ;;  %s7281_s9 = inlined_call_operand.vmem [shape: f32[64,64], index: 9, kind: input, shape index: {}]   ;;  %s7282_s10 = inlined_call_operand.hbm [shape: f32[1,64], index: 10, kind: input, shape index: {}]   ;;  %s7283_s11 = inlined_call_operand.hbm [shape: f32[1,64], index: 11, kind: input, shape index: {}]   ;;  %s7284_s12 = inlined_call_operand.vmem [shape: f32[64,64], index: 12, kind: input, shape index: {}]   ;;  %s7285_s13 = inlined_call_operand.hbm [shape: f32[1,64], index: 13, kind: input, shape index: {}]   ;;  %s7286_s14 = inlined_call_operand.hbm [shape: f32[1,64], index: 14, kind: input, shape index: {}]   ;;  %s7287_s15 = inlined_call_operand.vmem [shape: f32[64,64], index: 15, kind: input, shape index: {}]   ;;  %s7288_s16 = inlined_call_operand.vmem [shape: f32[1,64], index: 16, kind: input, shape index: {}]   ;;  %s7289_s17 = inlined_call_operand.hbm [shape: f32[1,64], index: 17, kind: input, shape index: {}]   ;;  %s7290_s18 = inlined_call_operand.vmem [shape: f32[128,64], index: 18, kind: input, shape index: {}]   ;;  %s7291_s19 = inlined_call_operand.hbm [shape: f32[32,64], index: 19, kind: input, shape index: {}]   ;;  %s7292_s20 = inlined_call_operand.hbm [shape: f32[384,64], index: 20, kind: output, shape index: {}]  }
   0x1   :  { %7297 = sst [smem:[#allocation19_spill]] %s7272_s0 }
   0x2   :  { %7298 = sst [smem:[#allocation20_spill]] %s7273_s1 }
   0x3   :  { %7299 = sst [smem:[#allocation21_spill]] %s7274_s2 }
   0x4   :  { %7300 = sst [smem:[#allocation22_spill]] %s7275_s3 }
   0x5   :  { %7301 = sst [smem:[#allocation23_spill]] %s7276_s4 }
   0x6   :  { %25 = vsyncpa [#allocation3], 0 }
   0x7   :  { %26 = vsyncpa [#allocation6], 0 }
   0x8   :  { %27 = vsyncpa [#allocation9], 0 }
   0x9   :  { %28 = vsyncpa [#allocation12], 0 }
   0xa   :  { %29 = vsyncpa [#allocation4], 0  ;;  %s6158_s1 = smov [#allocation5]   ;;  %s6159_s23 = smov [#allocation8]  }
   0xb   :  { %s66_s22 = sshll.u32 %s6158_s1, 4  ;;  %s88_s24 = sshll.u32 %s6159_s23, 4  ;;  %s67_s22 = int_to_ptr.vmem [resolvable:$true] %s66_s22  ;;  %s89_s24 = int_to_ptr.vmem [resolvable:$true] %s88_s24 }
   0xc   :  { %s5994_s3 = scalar_lea.hbm %s7283_s11, 16 }
   0xd   :  { %p5995_p0 = scmp.ne.s32.totalorder %s7283_s11, %s5994_s3  ;;  %p5998_p1 = scmp.lt.u32.totalorder %s5994_s3, %s7283_s11 }
   0xf   :  { %p6000_p2 = pnand %p5998_p1, %p5995_p0 }
  0x11   :  { %6003 = shalt.err (!%p6000_p2)
}
  0x12   :  { %s6004_s29 = scalar_lea.vmem %s67_s22, 16  ;;  %s6008_s30 = scalar_lea.vmem %s67_s22, 32 }
  0x13   :  { %p6005_p3 = scmp.ne.s32.totalorder %s67_s22, %s6004_s29  ;;  %p6009_p4 = scmp.lt.s32.totalorder %s67_s22, %s67_s22 }
  0x14   :  { %p6010_p5 = scmp.lt.s32.totalorder %s6008_s30, %s6004_s29 }
  0x16   :  { %p6011_p6 = por %p6010_p5, %p6009_p4 }
  0x18   :  { %p6012_p7 = pnand %p6011_p6, %p6005_p3 }
  0x1a   :  { %6015 = shalt.err (!%p6012_p7)
}
  0x1b   :  { %69 = dma.hbm_to_vmem [thread:$0]  %s7283_s11, 16, %s67_s22, [#allocation6]  }
  0x1c   :  { %s6016_s2 = scalar_lea.hbm %s7286_s14, 16 }
  0x1d   :  { %p6017_p8 = scmp.ne.s32.totalorder %s7286_s14, %s6016_s2  ;;  %p6020_p9 = scmp.lt.u32.totalorder %s6016_s2, %s7286_s14 }
  0x1f   :  { %p6022_p10 = pnand %p6020_p9, %p6017_p8 }
  0x21   :  { %6025 = shalt.err (!%p6022_p10)
}
  0x22   :  { %s6026_s28 = scalar_lea.vmem %s89_s24, 16  ;;  %s6030_s4 = scalar_lea.vmem %s89_s24, 32 }
  0x23   :  { %p6027_p11 = scmp.ne.s32.totalorder %s89_s24, %s6026_s28  ;;  %p6031_p12 = scmp.lt.s32.totalorder %s89_s24, %s89_s24 }
  0x24   :  { %p6032_p13 = scmp.lt.s32.totalorder %s6030_s4, %s6026_s28 }
  0x26   :  { %p6033_p0 = por %p6032_p13, %p6031_p12 }
  0x28   :  { %p6034_p1 = pnand %p6033_p0, %p6027_p11 }
  0x2a   :  { %6037 = shalt.err (!%p6034_p1)
}
  0x2b   :  { %91 = dma.hbm_to_vmem [thread:$0]  %s7286_s14, 16, %s89_s24, [#allocation9]  }
  0x2c   :  { %s6160_s29 = smov [#allocation2]   ;;  %s6161_s0 = smov [#allocation7]  }
  0x2d   :  { %s56_s30 = sshll.u32 %s6160_s29, 4  ;;  %s78_s21 = sshll.u32 %s6161_s0, 4  ;;  %s57_s30 = int_to_ptr.vmem [resolvable:$true] %s56_s30  ;;  %s79_s21 = int_to_ptr.vmem [resolvable:$true] %s78_s21 }
  0x2e   :  { %s6038_s2 = scalar_lea.hbm %s7282_s10, 16 }
  0x2f   :  { %p6039_p2 = scmp.ne.s32.totalorder %s7282_s10, %s6038_s2  ;;  %p6042_p3 = scmp.lt.u32.totalorder %s6038_s2, %s7282_s10 }
  0x31   :  { %p6044_p4 = pnand %p6042_p3, %p6039_p2 }
  0x33   :  { %6047 = shalt.err (!%p6044_p4)
}
  0x34   :  { %s6048_s14 = scalar_lea.vmem %s57_s30, 16  ;;  %s6052_s24 = scalar_lea.vmem %s57_s30, 32 }
  0x35   :  { %p6049_p5 = scmp.ne.s32.totalorder %s57_s30, %s6048_s14  ;;  %p6053_p6 = scmp.lt.s32.totalorder %s57_s30, %s57_s30 }
  0x36   :  { %p6054_p7 = scmp.lt.s32.totalorder %s6052_s24, %s6048_s14 }
  0x38   :  { %p6055_p8 = por %p6054_p7, %p6053_p6 }
  0x3a   :  { %p6056_p9 = pnand %p6055_p8, %p6049_p5 }
  0x3c   :  { %6059 = shalt.err (!%p6056_p9)
}
  0x3d   :  { %59 = dma.hbm_to_vmem [thread:$0]  %s7282_s10, 16, %s57_s30, [#allocation3]  }
  0x3e   :  { %s6060_s29 = scalar_lea.hbm %s7285_s13, 16 }
  0x3f   :  { %p6061_p10 = scmp.ne.s32.totalorder %s7285_s13, %s6060_s29  ;;  %p6064_p11 = scmp.lt.u32.totalorder %s6060_s29, %s7285_s13 }
  0x41   :  { %p6066_p12 = pnand %p6064_p11, %p6061_p10 }
  0x43   :  { %6069 = shalt.err (!%p6066_p12)
}
  0x44   :  { %s6070_s25 = scalar_lea.vmem %s79_s21, 16  ;;  %s6074_s3 = scalar_lea.vmem %s79_s21, 32 }
  0x45   :  { %p6071_p13 = scmp.ne.s32.totalorder %s79_s21, %s6070_s25  ;;  %p6075_p0 = scmp.lt.s32.totalorder %s79_s21, %s79_s21 }
  0x46   :  { %p6076_p1 = scmp.lt.s32.totalorder %s6074_s3, %s6070_s25 }
  0x48   :  { %p6077_p2 = por %p6076_p1, %p6075_p0 }
  0x4a   :  { %p6078_p3 = pnand %p6077_p2, %p6071_p13 }
  0x4c   :  { %6081 = shalt.err (!%p6078_p3)
}
  0x4d   :  { %81 = dma.hbm_to_vmem [thread:$0]  %s7285_s13, 16, %s79_s21, [#allocation6]  }
  0x4e   :  { %s6162_s26 = smov [#allocation10]   ;;  %s6163_s14 = smov [#allocation11]  }
  0x4f   :  { %s102_s27 = sshll.u32 %s6162_s26, 4  ;;  %s113_s24 = sshll.u32 %s6163_s14, 4  ;;  %s103_s27 = int_to_ptr.vmem [resolvable:$true] %s102_s27  ;;  %s6325_s24 = int_to_ptr.vmem [resolvable:$true] %s113_s24 }
  0x50   :  { %s6082_s11 = scalar_lea.hbm %s7289_s17, 16 }
  0x51   :  { %p6083_p4 = scmp.ne.s32.totalorder %s7289_s17, %s6082_s11  ;;  %p6086_p5 = scmp.lt.u32.totalorder %s6082_s11, %s7289_s17 }
  0x53   :  { %p6088_p6 = pnand %p6086_p5, %p6083_p4 }
  0x55   :  { %6091 = shalt.err (!%p6088_p6)
}
  0x56   :  { %s6092_s13 = scalar_lea.vmem %s103_s27, 16  ;;  %s6096_s21 = scalar_lea.vmem %s103_s27, 32 }
  0x57   :  { %p6093_p7 = scmp.ne.s32.totalorder %s103_s27, %s6092_s13  ;;  %p6097_p8 = scmp.lt.s32.totalorder %s103_s27, %s103_s27 }
  0x58   :  { %p6098_p9 = scmp.lt.s32.totalorder %s6096_s21, %s6092_s13 }
  0x5a   :  { %p6099_p10 = por %p6098_p9, %p6097_p8 }
  0x5c   :  { %p6100_p11 = pnand %p6099_p10, %p6093_p7 }
  0x5e   :  { %6103 = shalt.err (!%p6100_p11)
}
  0x5f   :  { %105 = dma.hbm_to_vmem [thread:$0]  %s7289_s17, 16, %s103_s27, [#allocation9]  }
  0x60   :  { %s6104_s10 = scalar_lea.hbm %s7291_s19, 512 }
  0x61   :  { %p6105_p12 = scmp.ne.s32.totalorder %s7291_s19, %s6104_s10  ;;  %p6108_p13 = scmp.lt.u32.totalorder %s6104_s10, %s7291_s19 }
  0x63   :  { %p6110_p0 = pnand %p6108_p13, %p6105_p12 }
  0x65   :  { %6113 = shalt.err (!%p6110_p0)
}
  0x66   :  { %s6114_s4 = scalar_lea.vmem %s6325_s24, 512  ;;  %p6119_p2 = scmp.lt.s32.totalorder %s6325_s24, %s6325_s24 }
  0x67   :  { %p6115_p1 = scmp.ne.s32.totalorder %s6325_s24, %s6114_s4  ;;  %p6120_p3 = scmp.lt.s32.totalorder %s6114_s4, %s6114_s4 }
  0x69   :  { %p6121_p4 = por %p6120_p3, %p6119_p2 }
  0x6b   :  { %p6122_p5 = pnand %p6121_p4, %p6115_p1 }
  0x6d   :  { %6125 = shalt.err (!%p6122_p5)
}
  0x6e   :  { %s6164_s17 = smov 128   ;;  %s6165_s27 = smov 8  }
  0x6f   :  { %119 = dma.hbm_to_vmem [thread:$0]  %s7291_s19, 512, %s6325_s24, [#allocation12], %s6164_s17, %s6164_s17, %s6165_s27  }
  0x70   :  { %6148 = dma.done.wait [#allocation3], 16  }
  0x71   :  { %6149 = vsyncadd [#allocation3], 4294967280 }
  0x72   :  { %6150 = dma.done.wait [#allocation6], 32  }
  0x73   :  { %6151 = vsyncadd [#allocation6], 4294967264 }
  0x74   :  { %6152 = dma.done.wait [#allocation9], 32  }
  0x75   :  { %6153 = vsyncadd [#allocation9], 4294967264 }
  0x76   :  { %6154 = dma.done.wait [#allocation12], 512  }
  0x77   :  { %6155 = vsyncadd [#allocation12], 4294966784  ;;  %v6166_v0 = vmov 0.0   ;;  %vm6167_vm0 = vmmov 0   ;;  %s7302_s29 = sld [smem:[#allocation21_spill]]  ;;  %s7303_s23 = sld [smem:[#allocation19_spill]] }
  0x78   :  { %5109 = vmatprep.subr.bf16.mxu0 %v6166_v0  ;;  %5113 = vmatprep.mubr.msk.bf16.mxu0 %vm6167_vm0, %v6166_v0  ;;  %vm156_vm1 = vcmask 261120   ;;  %vm264_vm2 = vcmask 1041408   ;;  %s7304_s14 = sld [smem:[#allocation20_spill]]  ;;  %vm260_vm3 = vcmask 15360   ;;  %v702_v32 = vld [vmem:[%s7281_s9] sm:$0xff]  ;;  %v703_v33 = vld [vmem:[%s7281_s9 + $0x8] sm:$0xff] }
  0x79   :  { %5125 = vmatprep.subr.mxu1 %v6166_v0  ;;  %5127 = vmatprep.mubr.msk.f32.mxu1 %vm6167_vm0, %v6166_v0  ;;  %v5696_v34 = vpack.c.bf16 %v703_v33, %v702_v32  ;;  %v6168_v35 = vmov 0.0|0.0   ;;  %v704_v36 = vld [vmem:[%s7281_s9 + $0x10] sm:$0xff]  ;;  %v705_v37 = vld [vmem:[%s7281_s9 + $0x18] sm:$0xff]  ;;  %v706_v39 = vld [vmem:[%s7281_s9 + $0x20] sm:$0xff]  ;;  %vm686_vm4 = vcmask 523264   ;;  %s7305_s2 = sld [smem:[#allocation23_spill]] }
  0x7a   :  { %v5699_v38 = vpack.c.bf16 %v705_v37, %v704_v36  ;;  %v707_v40 = vld [vmem:[%s7281_s9 + $0x28] sm:$0xff]  ;;  %v708_v42 = vld [vmem:[%s7281_s9 + $0x30] sm:$0xff]  ;;  %v709_v43 = vld [vmem:[%s7281_s9 + $0x38] sm:$0xff]  ;;  %vm1036_vm5 = vcmask 64512   ;;  %vm1880_vm6 = vcmask 130048   ;;  %s6169_s9 = smov 96  }
  0x7b   :  { %v5702_v41 = vpack.c.bf16 %v707_v40, %v706_v39  ;;  %v5705_v44 = vpack.c.bf16 %v709_v43, %v708_v42 }
  0x7d   :  { %v5916_v1 = vld [vmem:[%s7302_s29] sm:$0xff]   ;;  %v5917_v2 = vld [vmem:[%s7302_s29 + $0x8] sm:$0xff]   ;;  %v5918_v4 = vld [vmem:[%s7302_s29 + $0x10] sm:$0xff]  }
  0x7e   :  { %5110 = vmatpush3.bf16.msra.mxu0 %v5916_v1  ;;  %v139_v3 = vld [vmem:[%s7303_s23] sm:$0x1]  ;;  %v5919_v5 = vld [vmem:[%s7302_s29 + $0x18] sm:$0xff]   ;;  %v4474_v10 = vld [vmem:[%s7304_s14 + $0x8] sm:$0xff] }
  0x7f   :  { %5111 = vmatprep.subr.bf16.mxu0 %v6166_v0  ;;  %v5920_v11 = vld [vmem:[%s7302_s29 + $0x20] sm:$0xff]   ;;  %v5921_v16 = vld [vmem:[%s7302_s29 + $0x28] sm:$0xff]   ;;  %v5922_v17 = vld [vmem:[%s7302_s29 + $0x30] sm:$0xff]  }
  0x80   :  { %v5923_v18 = vld [vmem:[%s7302_s29 + $0x38] sm:$0xff]   ;;  %v200_v19 = vld [vmem:[%s7304_s14] sm:$0xff]  ;;  %v4486_v22 = vld [vmem:[%s7304_s14 + $0x10] sm:$0xff] }
  0x81   :  { %v4496_v27 = vld [vmem:[%s7304_s14 + $0x18] sm:$0xff]  ;;  %v5924_v63 = vld [vmem:[%s7305_s2 + $0x20] sm:$0xff]   ;;  %v5933_v33 = vld [vmem:[%s7305_s2 + $0x48] sm:$0xff]   ;;  %s7306_s14 = sld [smem:[#allocation22_spill]] }
  0x82   :  { %5112 = vmatpush3.bf16.msra.mxu0 %v5917_v2  ;;  %v5925_v1 = vld [vmem:[%s7305_s2] sm:$0xff]   ;;  %v5926_v2 = vld [vmem:[%s7305_s2 + $0x28] sm:$0xff]   ;;  %v5935_v36 = vld [vmem:[%s7305_s2 + $0x58] sm:$0xff]  }
  0x83   :  { %5117 = vmatprep.subr.bf16.mxu0 %v6166_v0 }
  0x85   :  { %5114 = vmatmul.mubr.msk.bf16.vlgmr.msra.gmra.mrb[0].mxu0 %vm156_vm1, %v139_v3 }
  0x86   :  { %5118 = vmatpush3.bf16.msra.mxu0 %v5918_v4  ;;  %5121 = vmatprep.mubr.msk.bf16.mxu0 %vm6167_vm0, %v6166_v0  ;;  %v5928_v4 = vld [vmem:[%s7305_s2 + $0x30] sm:$0xff]  }
  0x87   :  { %5119 = vmatprep.subr.bf16.mxu0 %v6166_v0  ;;  %v4519_v37 = vld [vmem:[%s7306_s14 + $0x10] sm:$0xff]  ;;  %v4520_v40 = vld [vmem:[%s7306_s14 + $0x18] sm:$0xff]  ;;  %v958_v43 = vld [vmem:[%s7306_s14] sm:$0xff] }
  0x8a   :  { %5120 = vmatpush3.bf16.msra.mxu0 %v5919_v5  ;;  %v5929_v5 = vld [vmem:[%s7305_s2 + $0x10] sm:$0xff]  }
  0x8b   :  { %5130 = vmatprep.subr.mxu0 %v6166_v0 }
  0x8d   :  { %5122 = vmatmul.mubr.msk.bf16.vlgmr.msra.gmra.mrb[4].mxu0 %vm156_vm1, %v139_v3 }
  0x8e   :  { %5132 = vmatprep.mubr.msk.f32.mxu0 %vm6167_vm0, %v6166_v0 }
 0x158   :  { %v194_v6 = vpop.f32.mrb[0].mxu0 }
 0x159   :  { %v5115_v7 = vpop.f32.mrb[1].mxu0  ;;  %5131 = vmatpush3.msk.msra.mxu0 %vm264_vm2, %v194_v6  ;;  %v5930_v6 = vld [vmem:[%s7305_s2 + $0x38] sm:$0xff]  }
 0x15a   :  { %v197_v8 = vpop.f32.mrb[2].mxu0  ;;  %5143 = vmatprep.subr.mxu0 %v6166_v0  ;;  %5133 = vmatmul.mubr.msk.f32.vlgmr.msra.gmra.mrb[8].mxu0 %vm260_vm3, %v200_v19  ;;  %v5931_v7 = vld [vmem:[%s7305_s2 + $0x18] sm:$0xff]   ;;  %v860_v19 = vld [vmem:[#allocation2] sm:$0x1] }
 0x15b   :  { %v5116_v9 = vpop.f32.mrb[3].mxu0  ;;  %5145 = vmatprep.mubr.msk.f32.mxu0 %vm6167_vm0, %v6166_v0 }
 0x160   :  { %v252_v12 = vpop.f32.mrb[4].mxu0 }
 0x161   :  { %v5123_v13 = vpop.f32.mrb[5].mxu0  ;;  %5126 = vmatpush3.msk.msra.mxu1 %vm264_vm2, %v252_v12 }
 0x162   :  { %v255_v14 = vpop.f32.mrb[6].mxu0  ;;  %5128 = vmatmul.mubr.msk.f32.vlgmr.msra.gmra.mrb[0].mxu1 %vm260_vm3, %v4474_v10  ;;  %5135 = vmatprep.subr.bf16.mxu1 %v6166_v0 }
 0x163   :  { %v5124_v15 = vpop.f32.mrb[7].mxu0  ;;  %5136 = vmatpush3.bf16.msra.mxu1 %v5920_v11  ;;  %5139 = vmatprep.mubr.msk.bf16.mxu1 %vm6167_vm0, %v6166_v0 }
 0x164   :  { %5137 = vmatprep.subr.bf16.mxu1 %v6166_v0 }
 0x167   :  { %5138 = vmatpush3.bf16.msra.mxu1 %v5921_v16 }
 0x168   :  { %5148 = vmatprep.subr.bf16.mxu1 %v6166_v0 }
 0x16a   :  { %5140 = vmatmul.mubr.msk.bf16.vlgmr.msra.gmra.mrb[4].mxu1 %vm156_vm1, %v139_v3 }
 0x16b   :  { %5149 = vmatpush3.bf16.msra.mxu1 %v5922_v17  ;;  %5152 = vmatprep.mubr.msk.bf16.mxu1 %vm6167_vm0, %v6166_v0  ;;  %v868_v17 = vlaneseq }
 0x16c   :  { %5150 = vmatprep.subr.bf16.mxu1 %v6166_v0 }
 0x16f   :  { %5151 = vmatpush3.bf16.msra.mxu1 %v5923_v18  ;;  %v869_v18 = vshrl.u32 %v868_v17, 7 }
 0x170   :  { %5695 = vmatprep.subr.bf16.mxu1 %v6168_v35 }
 0x172   :  { %5153 = vmatmul.mubr.msk.bf16.vlgmr.msra.gmra.mrb[8].mxu1 %vm156_vm1, %v139_v3  ;;  %v5927_v3 = vld [vmem:[%s7305_s2 + $0x8] sm:$0xff]  }
 0x173   :  { %5177 = vmatprep.mubr.msk.f32.mxu1 %vm6167_vm0, %v6166_v0  ;;  %5697 = vmatpush3.bf16.msra.mxu1 %v5696_v34 }
 0x174   :  { %5698 = vmatprep.subr.bf16.mxu1 %v6168_v35 }
 0x177   :  { %5700 = vmatpush3.bf16.msra.mxu1 %v5699_v38 }
 0x178   :  { %5701 = vmatprep.subr.bf16.mxu1 %v6168_v35 }
 0x17b   :  { %5703 = vmatpush3.bf16.msra.mxu1 %v5702_v41 }
 0x17c   :  { %5704 = vmatprep.subr.bf16.mxu1 %v6168_v35 }
 0x17f   :  { %5706 = vmatpush3.bf16.msra.mxu1 %v5705_v44 }
 0x180   :  { %5199 = vmatprep.subr.bf16.mxu1 %v6166_v0 }
 0x235   :  { %v334_v20 = vpop.f32.mrb[0].mxu1 }
 0x236   :  { %v5129_v21 = vpop.f32.mrb[1].mxu1 }
 0x23d   :  { %v465_v23 = vpop.f32.mrb[4].mxu1 }
 0x23e   :  { %v5141_v24 = vpop.f32.mrb[5].mxu1  ;;  %5144 = vmatpush3.msk.msra.mxu0 %vm264_vm2, %v465_v23  ;;  %v864_v23 = vld [vmem:[#allocation5] sm:$0x1] }
 0x23f   :  { %v468_v25 = vpop.f32.mrb[6].mxu1  ;;  %5146 = vmatmul.mubr.msk.f32.vlgmr.msra.gmra.mrb[8].mxu0 %vm260_vm3, %v4486_v22  ;;  %5156 = vmatprep.subr.mxu0 %v6166_v0 }
 0x240   :  { %v5142_v26 = vpop.f32.mrb[7].mxu1  ;;  %5158 = vmatprep.mubr.msk.f32.mxu0 %vm6167_vm0, %v6166_v0 }
 0x245   :  { %v601_v28 = vpop.f32.mrb[8].mxu1 }
 0x246   :  { %v5154_v29 = vpop.f32.mrb[9].mxu1  ;;  %5157 = vmatpush3.msk.msra.mxu0 %vm264_vm2, %v601_v28 }
 0x247   :  { %v604_v30 = vpop.f32.mrb[10].mxu1  ;;  %5159 = vmatmul.mubr.msk.f32.vlgmr.msra.gmra.mrb[8].mxu0 %vm260_vm3, %v4496_v27  ;;  %5707 = vmatprep.subr.bf16.mxu0 %v6168_v35 }
 0x248   :  { %v5155_v31 = vpop.f32.mrb[11].mxu1  ;;  %5196 = vmatprep.mubr.msk.f32.mxu0 %vm6167_vm0, %v6166_v0  ;;  %5709 = vmatpush3.bf16.msra.mxu0 %v5696_v34  ;;  %v5934_v34 = vld [vmem:[%s7305_s2 + $0x50] sm:$0xff]  }
 0x249   :  { %5710 = vmatprep.subr.bf16.mxu0 %v6168_v35  ;;  %v5932_v31 = vld [vmem:[%s7305_s2 + $0x40] sm:$0xff]  }
 0x24c   :  { %5712 = vmatpush3.bf16.msra.mxu0 %v5699_v38 }
 0x24d   :  { %5713 = vmatprep.subr.bf16.mxu0 %v6168_v35 }
 0x250   :  { %5715 = vmatpush3.bf16.msra.mxu0 %v5702_v41 }
 0x251   :  { %5716 = vmatprep.subr.bf16.mxu0 %v6168_v35 }
 0x254   :  { %5718 = vmatpush3.bf16.msra.mxu0 %v5705_v44 }
 0x255   :  { %5211 = vmatprep.subr.bf16.mxu0 %v6166_v0 }
 0x31a   :  { %v681_v45 = vpop.f32.mrb[8].mxu0 }
 0x31b   :  { %v6476_v46 = vadd.f32 %v681_v45, %v334_v20  ;;  %v5160_v47 = vpop.f32.mrb[9].mxu0  ;;  %v6520_v20 = vsub.s32 0, %v869_v18 }
 0x31d   :  { %v687_v48 = vsel %vm686_vm4, %v6476_v46, 0.0  ;;  %v694_v49 = vmul.f32 %v6476_v46, %v6476_v46 }
 0x31e   :  { %v688_v50 = vrot.slane %v687_v48, 4 }
 0x31f   :  { %v695_v51 = vsel %vm686_vm4, %v694_v49, 0.0  ;;  %v4538_v49 = vld [vmem:[%s7306_s14 + $0x20] sm:$0xff] }
 0x320   :  { %v689_v52 = vadd.f32 %v688_v50, %v687_v48  ;;  %v696_v53 = vrot.slane %v695_v51, 4  ;;  %v959_v48 = vld [vmem:[%s7306_s14 + $0x8] sm:$0xff] }
 0x322   :  { %v690_v54 = vrot.slane %v689_v52, 2  ;;  %v697_v55 = vadd.f32 %v696_v53, %v695_v51  ;;  %v4539_v51 = vld [vmem:[%s7306_s14 + $0x28] sm:$0xff] }
 0x324   :  { %v691_v56 = vadd.f32 %v690_v54, %v689_v52  ;;  %v698_v57 = vrot.slane %v697_v55, 2  ;;  %v5936_v52 = vld [vmem:[%s7305_s2 + $0x60] sm:$0xff]  }
 0x326   :  { %v692_v58 = vrot.slane %v691_v56, 1  ;;  %v699_v59 = vadd.f32 %v698_v57, %v697_v55  ;;  %v5938_v57 = vld [vmem:[%s7305_s2 + $0x70] sm:$0xff]  }
 0x328   :  { %v693_v60 = vadd.f32 %v692_v58, %v691_v56  ;;  %v700_v61 = vrot.slane %v699_v59, 1  ;;  %v5937_v56 = vld [vmem:[%s7305_s2 + $0x68] sm:$0xff]   ;;  %v5939_v58 = vld [vmem:[%s7305_s2 + $0x78] sm:$0xff]  }
 0x32a   :  { %5178 = vmatmul.mubr.msk.f32.vlgmr.msra.gmra.mrb[2].mxu1 %vm686_vm4, %v693_v60  ;;  %v701_v62 = vadd.f32 %v700_v61, %v699_v59  ;;  %v4555_v59 = vld [vmem:[%s7306_s14 + $0x30] sm:$0xff]  ;;  %v4556_v61 = vld [vmem:[%s7306_s14 + $0x38] sm:$0xff] }
 0x32b   :  { %5207 = vmatprep.mubr.msk.bf16.mxu1 %vm6167_vm0, %v6166_v0  ;;  %5200 = vmatpush3.bf16.msra.mxu1 %v5925_v1 }
 0x32c   :  { %5197 = vmatmul.mubr.msk.f32.vlgmr.msra.gmra.mrb[10].mxu0 %vm686_vm4, %v701_v62  ;;  %5201 = vmatprep.subr.bf16.mxu1 %v6166_v0 }
 0x32d   :  { %5219 = vmatprep.mubr.msk.bf16.mxu0 %vm6167_vm0, %v6166_v0  ;;  %5212 = vmatpush3.bf16.msra.mxu0 %v5924_v63 }
 0x32e   :  { %5213 = vmatprep.subr.bf16.mxu0 %v6166_v0 }
 0x32f   :  { %5202 = vmatpush3.bf16.msra.mxu1 %v5927_v3  ;;  %v1538_v3 = vld [vmem:[%s7284_s12 + $0x8] sm:$0xff] }
 0x330   :  { %5203 = vmatprep.subr.bf16.mxu1 %v6166_v0 }
 0x331   :  { %5214 = vmatpush3.bf16.msra.mxu0 %v5926_v2  ;;  %v1537_v2 = vld [vmem:[%s7284_s12] sm:$0xff] }
 0x332   :  { %5215 = vmatprep.subr.bf16.mxu0 %v6166_v0 }
 0x333   :  { %5204 = vmatpush3.bf16.msra.mxu1 %v5929_v5  ;;  %v1539_v5 = vld [vmem:[%s7284_s12 + $0x10] sm:$0xff] }
 0x334   :  { %5205 = vmatprep.subr.bf16.mxu1 %v6166_v0 }
 0x335   :  { %5216 = vmatpush3.bf16.msra.mxu0 %v5928_v4  ;;  %v5720_v4 = vpack.c.bf16 %v1538_v3, %v1537_v2 }
 0x336   :  { %5217 = vmatprep.subr.bf16.mxu0 %v6166_v0 }
 0x337   :  { %5206 = vmatpush3.bf16.msra.mxu1 %v5931_v7 }
 0x339   :  { %5218 = vmatpush3.bf16.msra.mxu0 %v5930_v6  ;;  %v1540_v6 = vld [vmem:[%s7284_s12 + $0x18] sm:$0xff] }
 0x33a   :  { %5233 = vmatprep.subr.bf16.mxu0 %v6166_v0  ;;  %v5723_v7 = vpack.c.bf16 %v1540_v6, %v1539_v5  ;;  %v5948_v6 = vld [vmem:[%s7278_s6 + $0x40] sm:$0xff]  }
 0x3fd   :  { %v779_v8 = vpop.f32.mrb[2].mxu1 }
 0x3fe   :  { %v783_v9 = vmul.f32 0.03125, %v779_v8  ;;  %v5179_v10 = vpop.f32.mrb[3].mxu1  ;;  %v1541_v8 = vld [vmem:[%s7284_s12 + $0x20] sm:$0xff] }
 0x3ff   :  { %v853_v11 = vpop.f32.mrb[10].mxu0 }
 0x400   :  { %v858_v12 = vmul.f32 %v783_v9, %v783_v9  ;;  %v857_v13 = vmul.f32 0.03125, %v853_v11  ;;  %v5198_v14 = vpop.f32.mrb[11].mxu0  ;;  %v1543_v11 = vld [vmem:[%s7284_s12 + $0x30] sm:$0xff] }
 0x402   :  { %v859_v15 = vsub.f32 %v857_v13, %v858_v12  ;;  %v1544_v12 = vld [vmem:[%s7284_s12 + $0x38] sm:$0xff] }
 0x403   :  { %v5729_v13 = vpack.c.bf16 %v1544_v12, %v1543_v11  ;;  %v4579_v11 = vld [vmem:[%s7277_s5 + $0x20] sm:$0xff] }
 0x404   :  { %v861_v16 = vadd.f32 1e-05, %v859_v15 }
 0x406   :  { %5972 = vrsqrt.f32 %v861_v16 }
 0x410   :  { %v5973_v21 = vpop.eup %5972 }
 0x411   :  { %v863_v22 = vmul.f32 %v5973_v21, %v860_v19 }
 0x413   :  { %v865_v24 = vmul.f32 %v863_v22, %v783_v9  ;;  %v871_v25 = vrot.slane %v863_v22, %v6520_v20  ;;  %v1542_v9 = vld [vmem:[%s7284_s12 + $0x28] sm:$0xff] }
 0x414   :  { %v5726_v10 = vpack.c.bf16 %v1542_v9, %v1541_v8  ;;  %v5949_v8 = vld [vmem:[%s7278_s6 + $0x48] sm:$0xff]   ;;  %v5950_v9 = vld [vmem:[%s7278_s6 + $0x50] sm:$0xff]  }
 0x415   :  { %v866_v26 = vsub.f32 %v864_v23, %v865_v24  ;;  %v873_v27 = vmul.f32 %v6476_v46, %v871_v25 }
 0x417   :  { %v878_v28 = vrot.slane %v866_v26, %v6520_v20 }
 0x419   :  { %v880_v29 = vadd.f32 %v878_v28, %v873_v27 }
 0x41b   :  { %v881_v30 = vmax.f32 %v880_v29, 0.0 }
 0x41d   :  { %v882_v32 = vpack.c.bf16 %v881_v30, %v881_v30 }
 0x41f   :  { %5208 = vmatmul.mubr.msk.bf16.vlgmr.msra.gmra.mrb[12].mxu1 %vm686_vm4, %v882_v32  ;;  %5220 = vmatmul.mubr.msk.bf16.vlgmr.msra.gmra.mrb[12].mxu0 %vm686_vm4, %v882_v32 }
 0x420   :  { %5234 = vmatpush3.bf16.msra.mxu0 %v5932_v31  ;;  %5241 = vmatprep.mubr.msk.bf16.mxu0 %vm6167_vm0, %v6166_v0 }
 0x421   :  { %5235 = vmatprep.subr.bf16.mxu0 %v6166_v0  ;;  %5225 = vmatprep.mubr.msk.f32.mxu1 %vm1036_vm5, %v4519_v37 }
 0x424   :  { %5236 = vmatpush3.bf16.msra.mxu0 %v5933_v33 }
 0x425   :  { %5237 = vmatprep.subr.bf16.mxu0 %v6166_v0 }
 0x428   :  { %5238 = vmatpush3.bf16.msra.mxu0 %v5934_v34 }
 0x429   :  { %5239 = vmatprep.subr.bf16.mxu0 %v6166_v0 }
 0x42c   :  { %5240 = vmatpush3.bf16.msra.mxu0 %v5935_v36 }
 0x42d   :  { %5719 = vmatprep.subr.bf16.mxu0 %v6168_v35 }
 0x42f   :  { %5242 = vmatmul.mubr.msk.bf16.vlgmr.msra.gmra.mrb[16].mxu0 %vm686_vm4, %v882_v32 }
 0x430   :  { %5283 = vmatprep.mubr.msk.f32.mxu0 %vm6167_vm0, %v6166_v0  ;;  %5721 = vmatpush3.bf16.msra.mxu0 %v5720_v4 }
 0x431   :  { %5722 = vmatprep.subr.bf16.mxu0 %v6168_v35 }
 0x434   :  { %5724 = vmatpush3.bf16.msra.mxu0 %v5723_v7 }
 0x435   :  { %5725 = vmatprep.subr.bf16.mxu0 %v6168_v35 }
 0x438   :  { %5727 = vmatpush3.bf16.msra.mxu0 %v5726_v10 }
 0x439   :  { %5728 = vmatprep.subr.bf16.mxu0 %v6168_v35 }
 0x43c   :  { %5730 = vmatpush3.bf16.msra.mxu0 %v5729_v13 }
 0x43d   :  { %5731 = vmatprep.subr.bf16.mxu0 %v6168_v35 }
 0x4f2   :  { %v952_v38 = vpop.f32.mrb[12].mxu1  ;;  %v1027_v39 = vpop.f32.mrb[12].mxu0 }
 0x4f3   :  { %v5209_v41 = vpop.f32.mrb[13].mxu1  ;;  %v5221_v42 = vpop.f32.mrb[13].mxu0  ;;  %5223 = vmatprep.subr.mxu1 %v1027_v39 }
 0x4f4   :  { %v955_v44 = vpop.f32.mrb[14].mxu1  ;;  %v1030_v45 = vpop.f32.mrb[14].mxu0  ;;  %5224 = vmatpush3.msra.mxu1 %v1027_v39  ;;  %v5941_v39 = vld [vmem:[%s7278_s6] sm:$0xff]   ;;  %v5943_v41 = vld [vmem:[%s7278_s6 + $0x8] sm:$0xff]   ;;  %v5944_v42 = vld [vmem:[%s7278_s6 + $0x30] sm:$0xff]  }
 0x4f5   :  { %v5210_v46 = vpop.f32.mrb[15].mxu1  ;;  %v5222_v47 = vpop.f32.mrb[15].mxu0  ;;  %5226 = vmatmul.mubr.msk.f32.vlgmr.msra.gmra.mrb[16].mxu1 %vm1036_vm5, %v4520_v40  ;;  %5228 = vmatprep.subr.mxu1 %v952_v38  ;;  %v5942_v40 = vld [vmem:[%s7278_s6 + $0x28] sm:$0xff]   ;;  %v5946_v44 = vld [vmem:[%s7278_s6 + $0x38] sm:$0xff]  }
 0x4f6   :  { %5229 = vmatpush3.msra.mxu1 %v952_v38  ;;  %5230 = vmatprep.mubr.msk.f32.mxu1 %vm1036_vm5, %v958_v43  ;;  %v5940_v38 = vld [vmem:[%s7278_s6 + $0x20] sm:$0xff]   ;;  %v5945_v43 = vld [vmem:[%s7278_s6 + $0x10] sm:$0xff]   ;;  %v5947_v45 = vld [vmem:[%s7278_s6 + $0x18] sm:$0xff]  }
 0x4fd   :  { %5231 = vmatmul.mubr.msk.f32.vlgmr.msra.gmra.mrb[16].mxu1 %vm1036_vm5, %v959_v48 }
 0x4fe   :  { %5247 = vmatprep.mubr.msk.f32.mxu1 %vm1036_vm5, %v4538_v49 }
 0x502   :  { %v1266_v50 = vpop.f32.mrb[16].mxu0 }
 0x503   :  { %v5243_v53 = vpop.f32.mrb[17].mxu0  ;;  %5245 = vmatprep.subr.mxu1 %v1266_v50 }
 0x504   :  { %v1269_v54 = vpop.f32.mrb[18].mxu0  ;;  %5246 = vmatpush3.msra.mxu1 %v1266_v50 }
 0x505   :  { %v5244_v55 = vpop.f32.mrb[19].mxu0  ;;  %5250 = vmatprep.subr.bf16.mxu1 %v6166_v0  ;;  %5248 = vmatmul.mubr.msk.f32.vlgmr.msra.gmra.mrb[16].mxu1 %vm1036_vm5, %v4539_v51 }
 0x506   :  { %5251 = vmatpush3.bf16.msra.mxu1 %v5936_v52  ;;  %5258 = vmatprep.mubr.msk.bf16.mxu1 %vm6167_vm0, %v6166_v0  ;;  %v1695_v55 = vld [vmem:[#allocation7] sm:$0x1] }
 0x507   :  { %5252 = vmatprep.subr.bf16.mxu1 %v6166_v0 }
 0x50a   :  { %5253 = vmatpush3.bf16.msra.mxu1 %v5937_v56 }
 0x50b   :  { %5254 = vmatprep.subr.bf16.mxu1 %v6166_v0 }
 0x50e   :  { %5255 = vmatpush3.bf16.msra.mxu1 %v5938_v57 }
 0x50f   :  { %5256 = vmatprep.subr.bf16.mxu1 %v6166_v0 }
 0x512   :  { %5257 = vmatpush3.bf16.msra.mxu1 %v5939_v58  ;;  %v1699_v58 = vld [vmem:[#allocation8] sm:$0x1] }
 0x515   :  { %5259 = vmatmul.mubr.msk.bf16.vlgmr.msra.gmra.mrb[20].mxu1 %vm686_vm4, %v882_v32 }
 0x516   :  { %5264 = vmatprep.mubr.msk.f32.mxu1 %vm1036_vm5, %v4555_v59 }
 0x5e8   :  { %v1425_v60 = vpop.f32.mrb[20].mxu1 }
 0x5e9   :  { %v5260_v62 = vpop.f32.mrb[21].mxu1  ;;  %5262 = vmatprep.subr.mxu1 %v1425_v60 }
 0x5ea   :  { %v1428_v63 = vpop.f32.mrb[22].mxu1  ;;  %5263 = vmatpush3.msra.mxu1 %v1425_v60 }
 0x5eb   :  { %v5261_v1 = vpop.f32.mrb[23].mxu1  ;;  %5265 = vmatmul.mubr.msk.f32.vlgmr.msra.gmra.mrb[16].mxu1 %vm1036_vm5, %v4556_v61  ;;  %5305 = vmatprep.subr.bf16.mxu1 %v6166_v0 }
 0x5ec   :  { %5313 = vmatprep.mubr.msk.bf16.mxu1 %vm6167_vm0, %v6166_v0  ;;  %5306 = vmatpush3.bf16.msra.mxu1 %v5941_v39  ;;  %v4606_v39 = vld [vmem:[%s7277_s5 + $0x50] sm:$0xff] }
 0x5ed   :  { %5307 = vmatprep.subr.bf16.mxu1 %v6166_v0 }
 0x5f0   :  { %5308 = vmatpush3.bf16.msra.mxu1 %v5943_v41  ;;  %v4607_v41 = vld [vmem:[%s7277_s5 + $0x58] sm:$0xff] }
 0x5f1   :  { %5309 = vmatprep.subr.bf16.mxu1 %v6166_v0 }
 0x5f4   :  { %5310 = vmatpush3.bf16.msra.mxu1 %v5945_v43  ;;  %v5955_v43 = vld [vmem:[%s7278_s6 + $0x78] sm:$0xff]  }
 0x5f5   :  { %5311 = vmatprep.subr.bf16.mxu1 %v6166_v0 }
 0x5f8   :  { %5312 = vmatpush3.bf16.msra.mxu1 %v5947_v45 }
 0x6be   :  { %v6630_v14 = vpop.f32.mrb[16].mxu1 }
 0x6bf   :  { %v1518_v15 = vsel %vm686_vm4, %v6630_v14, 0.0  ;;  %v1527_v16 = vmul.f32 %v6630_v14, %v6630_v14  ;;  %v6636_v17 = vpop.f32.mrb[17].mxu1 }
 0x6c0   :  { %v1517_v18 = vsel %vm686_vm4, %v6636_v17, 0.0  ;;  %v1526_v19 = vmul.f32 %v6636_v17, %v6636_v17 }
 0x6c1   :  { %v1529_v21 = vsel %vm686_vm4, %v1527_v16, 0.0  ;;  %v1519_v22 = vadd.f32 %v1518_v15, %v1517_v18 }
 0x6c2   :  { %v1528_v23 = vsel %vm686_vm4, %v1526_v19, 0.0 }
 0x6c3   :  { %v1520_v24 = vrot.slane %v1519_v22, 4  ;;  %v1530_v25 = vadd.f32 %v1529_v21, %v1528_v23  ;;  %v4580_v23 = vld [vmem:[%s7277_s5 + $0x28] sm:$0xff] }
 0x6c5   :  { %v1521_v26 = vadd.f32 %v1520_v24, %v1519_v22  ;;  %v1531_v29 = vrot.slane %v1530_v25, 4  ;;  %v4581_v24 = vld [vmem:[%s7277_s5 + $0x30] sm:$0xff] }
 0x6c7   :  { %v1522_v27 = vrot.slane %v1521_v26, 2  ;;  %v1532_v32 = vadd.f32 %v1531_v29, %v1530_v25  ;;  %v4582_v25 = vld [vmem:[%s7277_s5 + $0x38] sm:$0xff] }
 0x6c9   :  { %v1523_v28 = vadd.f32 %v1522_v27, %v1521_v26  ;;  %v1533_v33 = vrot.slane %v1532_v32, 2  ;;  %v1797_v26 = vld [vmem:[%s7277_s5] sm:$0xff]  ;;  %v1798_v27 = vld [vmem:[%s7277_s5 + $0x8] sm:$0xff] }
 0x6cb   :  { %v1524_v30 = vrot.slane %v1523_v28, 1  ;;  %v1534_v34 = vadd.f32 %v1533_v33, %v1532_v32  ;;  %v1800_v32 = vld [vmem:[%s7277_s5 + $0x18] sm:$0xff] }
 0x6cd   :  { %v1525_v31 = vadd.f32 %v1524_v30, %v1523_v28  ;;  %v1535_v36 = vrot.slane %v1534_v34, 1  ;;  %v1799_v28 = vld [vmem:[%s7277_s5 + $0x10] sm:$0xff] }
 0x6cf   :  { %5284 = vmatmul.mubr.msk.f32.vlgmr.msra.gmra.mrb[20].mxu0 %vm686_vm4, %v1525_v31  ;;  %v1536_v37 = vadd.f32 %v1535_v36, %v1534_v34  ;;  %v4604_v36 = vld [vmem:[%s7277_s5 + $0x40] sm:$0xff] }
 0x6d0   :  { %5733 = vmatpush3.bf16.msra.mxu0 %v5720_v4  ;;  %5302 = vmatprep.mubr.msk.f32.mxu0 %vm6167_vm0, %v6166_v0 }
 0x6d1   :  { %5734 = vmatprep.subr.bf16.mxu0 %v6168_v35 }
 0x6d4   :  { %5736 = vmatpush3.bf16.msra.mxu0 %v5723_v7 }
 0x6d5   :  { %5737 = vmatprep.subr.bf16.mxu0 %v6168_v35 }
 0x6d8   :  { %5739 = vmatpush3.bf16.msra.mxu0 %v5726_v10  ;;  %v5951_v10 = vld [vmem:[%s7278_s6 + $0x58] sm:$0xff]  }
 0x6d9   :  { %5740 = vmatprep.subr.bf16.mxu0 %v6168_v35 }
 0x6dc   :  { %5742 = vmatpush3.bf16.msra.mxu0 %v5729_v13 }
 0x6dd   :  { %5317 = vmatprep.subr.bf16.mxu0 %v6166_v0 }
 0x6df   :  { %5303 = vmatmul.mubr.msk.f32.vlgmr.msra.gmra.mrb[22].mxu0 %vm686_vm4, %v1536_v37  ;;  %v4605_v37 = vld [vmem:[%s7277_s5 + $0x48] sm:$0xff] }
 0x6e0   :  { %5325 = vmatprep.mubr.msk.bf16.mxu0 %vm6167_vm0, %v6166_v0  ;;  %5318 = vmatpush3.bf16.msra.mxu0 %v5940_v38  ;;  %v5952_v38 = vld [vmem:[%s7278_s6 + $0x60] sm:$0xff]  }
 0x6e1   :  { %5319 = vmatprep.subr.bf16.mxu0 %v6166_v0 }
 0x6e4   :  { %5320 = vmatpush3.bf16.msra.mxu0 %v5942_v40  ;;  %v5953_v40 = vld [vmem:[%s7278_s6 + $0x68] sm:$0xff]  }
 0x6e5   :  { %5321 = vmatprep.subr.bf16.mxu0 %v6166_v0 }
 0x6e8   :  { %5322 = vmatpush3.bf16.msra.mxu0 %v5944_v42  ;;  %v5954_v42 = vld [vmem:[%s7278_s6 + $0x70] sm:$0xff]  }
 0x6e9   :  { %5323 = vmatprep.subr.bf16.mxu0 %v6166_v0 }
 0x6ec   :  { %5324 = vmatpush3.bf16.msra.mxu0 %v5946_v44  ;;  %v4625_v44 = vld [vmem:[%s7277_s5 + $0x60] sm:$0xff] }
 0x6ed   :  { %5349 = vmatprep.subr.bf16.mxu0 %v6166_v0 }
 0x7a2   :  { %v1614_v46 = vpop.f32.mrb[20].mxu0 }
 0x7a3   :  { %v5285_v47 = vpop.f32.mrb[21].mxu0  ;;  %v1618_v48 = vmul.f32 0.0078125, %v1614_v46 }
 0x7a5   :  { %v1693_v50 = vmul.f32 %v1618_v48, %v1618_v48 }
 0x7b2   :  { %v1688_v49 = vpop.f32.mrb[22].mxu0 }
 0x7b3   :  { %v1692_v51 = vmul.f32 0.0078125, %v1688_v49  ;;  %v5304_v52 = vpop.f32.mrb[23].mxu0 }
 0x7b4   :  { %v4628_v52 = vld [vmem:[%s7277_s5 + $0x78] sm:$0xff] }
 0x7b5   :  { %v1694_v53 = vsub.f32 %v1692_v51, %v1693_v50  ;;  %v4626_v50 = vld [vmem:[%s7277_s5 + $0x68] sm:$0xff]  ;;  %v4627_v51 = vld [vmem:[%s7277_s5 + $0x70] sm:$0xff] }
 0x7b7   :  { %v1696_v54 = vadd.f32 1e-05, %v1694_v53  ;;  %v2465_v53 = vld [vmem:[%s7287_s15] sm:$0xff] }
 0x7b9   :  { %5974 = vrsqrt.f32 %v1696_v54  ;;  %v2466_v54 = vld [vmem:[%s7287_s15 + $0x8] sm:$0xff] }
 0x7c3   :  { %v5975_v56 = vpop.eup %5974 }
 0x7c4   :  { %v1698_v57 = vmul.f32 %v5975_v56, %v1695_v55  ;;  %v5760_v55 = vpack.c.bf16 %v2466_v54, %v2465_v53  ;;  %v2467_v56 = vld [vmem:[%s7287_s15 + $0x10] sm:$0xff]  ;;  %v2623_v54 = vld [vmem:[%s7288_s16] sm:$0x1] }
 0x7c6   :  { %v1700_v59 = vmul.f32 %v1698_v57, %v1618_v48  ;;  %v1706_v60 = vrot.slane %v1698_v57, %v6520_v20  ;;  %v2468_v57 = vld [vmem:[%s7287_s15 + $0x18] sm:$0xff] }
 0x7c8   :  { %v1701_v61 = vsub.f32 %v1699_v58, %v1700_v59  ;;  %v1708_v62 = vmul.f32 %v1706_v60, %v6636_v17  ;;  %v1709_v63 = vmul.f32 %v6630_v14, %v1706_v60  ;;  %v5763_v58 = vpack.c.bf16 %v2468_v57, %v2467_v56  ;;  %v2469_v59 = vld [vmem:[%s7287_s15 + $0x20] sm:$0xff]  ;;  %v2470_v60 = vld [vmem:[%s7287_s15 + $0x28] sm:$0xff] }
 0x7c9   :  { %v2627_v57 = vld [vmem:[#allocation10] sm:$0x1] }
 0x7ca   :  { %v1714_v1 = vrot.slane %v1701_v61, %v6520_v20  ;;  %v5766_v61 = vpack.c.bf16 %v2470_v60, %v2469_v59 }
 0x7cc   :  { %v1716_v2 = vadd.f32 %v1714_v1, %v1708_v62  ;;  %v1717_v3 = vadd.f32 %v1714_v1, %v1709_v63  ;;  %v2471_v62 = vld [vmem:[%s7287_s15 + $0x30] sm:$0xff]  ;;  %v2472_v63 = vld [vmem:[%s7287_s15 + $0x38] sm:$0xff]  ;;  %s6171_s15 = smov [#allocation13]  }
 0x7cd   :  { %v5769_v1 = vpack.c.bf16 %v2472_v63, %v2471_v62  ;;  %s4449_s23 = sshll.u32 %s6171_s15, 4  ;;  %s4450_s23 = int_to_ptr.vmem [resolvable:$true] %s4449_s23 }
 0x7ce   :  { %v1718_v4 = vmax.f32 %v1716_v2, 0.0  ;;  %v1719_v5 = vmax.f32 %v1717_v3, 0.0  ;;  %s6126_s6 = scalar_lea.vmem %s4450_s23, 6144  ;;  %p6131_p7 = scmp.lt.s32.totalorder %s4450_s23, %s4450_s23 }
 0x7cf   :  { %p6127_p6 = scmp.ne.s32.totalorder %s4450_s23, %s6126_s6  ;;  %p6132_p8 = scmp.lt.s32.totalorder %s6126_s6, %s6126_s6 }
 0x7d0   :  { %v6692_v7 = vpack.c.bf16 %v1719_v5, %v1718_v4 }
 0x7d1   :  { %p6133_p9 = por %p6132_p8, %p6131_p7 }
 0x7d2   :  { %5314 = vmatmul.mubr.msk.bf16.vlgmr.msra.gmra.mrb[24].mxu1 %vm686_vm4, %v6692_v7  ;;  %5326 = vmatmul.mubr.msk.bf16.vlgmr.msra.gmra.mrb[24].mxu0 %vm686_vm4, %v6692_v7 }
 0x7d3   :  { %5350 = vmatpush3.bf16.msra.mxu0 %v5948_v6  ;;  %5357 = vmatprep.mubr.msk.bf16.mxu0 %vm6167_vm0, %v6166_v0  ;;  %p6134_p10 = pnand %p6133_p9, %p6127_p6 }
 0x7d4   :  { %5351 = vmatprep.subr.bf16.mxu0 %v6166_v0  ;;  %5333 = vmatprep.mubr.msk.f32.mxu1 %vm1880_vm6, %v4579_v11 }
 0x7d7   :  { %5352 = vmatpush3.bf16.msra.mxu0 %v5949_v8 }
 0x7d8   :  { %5353 = vmatprep.subr.bf16.mxu0 %v6166_v0 }
 0x7db   :  { %5354 = vmatpush3.bf16.msra.mxu0 %v5950_v9 }
 0x7dc   :  { %5355 = vmatprep.subr.bf16.mxu0 %v6166_v0 }
 0x7df   :  { %5356 = vmatpush3.bf16.msra.mxu0 %v5951_v10 }
 0x7e0   :  { %5759 = vmatprep.subr.bf16.mxu0 %v6168_v35 }
 0x7e2   :  { %5358 = vmatmul.mubr.msk.bf16.vlgmr.msra.gmra.mrb[28].mxu0 %vm686_vm4, %v6692_v7 }
 0x7e3   :  { %5409 = vmatprep.mubr.msk.f32.mxu0 %vm6167_vm0, %v6166_v0  ;;  %5761 = vmatpush3.bf16.msra.mxu0 %v5760_v55 }
 0x7e4   :  { %5762 = vmatprep.subr.bf16.mxu0 %v6168_v35 }
 0x7e7   :  { %5764 = vmatpush3.bf16.msra.mxu0 %v5763_v58 }
 0x7e8   :  { %5765 = vmatprep.subr.bf16.mxu0 %v6168_v35 }
 0x7eb   :  { %5767 = vmatpush3.bf16.msra.mxu0 %v5766_v61 }
 0x7ec   :  { %5768 = vmatprep.subr.bf16.mxu0 %v6168_v35 }
 0x7ef   :  { %5770 = vmatpush3.bf16.msra.mxu0 %v5769_v1 }
 0x7f0   :  { %5771 = vmatprep.subr.bf16.mxu0 %v6168_v35 }
 0x8a5   :  { %v1790_v12 = vpop.f32.mrb[24].mxu1  ;;  %v1868_v13 = vpop.f32.mrb[24].mxu0 }
 0x8a6   :  { %v5315_v14 = vpop.f32.mrb[25].mxu1  ;;  %v5327_v15 = vpop.f32.mrb[25].mxu0 }
 0x8a7   :  { %v1793_v16 = vpop.f32.mrb[26].mxu1  ;;  %v1871_v17 = vpop.f32.mrb[26].mxu0 }
 0x8a8   :  { %v5747_v18 = vpack.c.bf16 %v1793_v16, %v1790_v12  ;;  %v5743_v19 = vpack.c.bf16 %v1871_v17, %v1868_v13  ;;  %v5316_v21 = vpop.f32.mrb[27].mxu1  ;;  %v5328_v22 = vpop.f32.mrb[27].mxu0 }
 0x8aa   :  { %5744 = vmatprep.subr.bf16.mxu1 %v5743_v19 }
 0x8ab   :  { %5746 = vmatpush3.bf16.msra.mxu1 %v5743_v19 }
 0x8ac   :  { %5748 = vmatprep.subr.bf16.mxu1 %v5747_v18 }
 0x8ae   :  { %5334 = vmatmul.mubr.msk.f32.vlgmr.msra.gmra.mrb[18].mxu1 %vm1880_vm6, %v4580_v23 }
 0x8af   :  { %5750 = vmatpush3.bf16.msra.mxu1 %v5747_v18  ;;  %5336 = vmatprep.mubr.msk.f32.mxu1 %vm1880_vm6, %v4581_v24 }
 0x8b2   :  { %5337 = vmatmul.mubr.msk.f32.gmra.mrb[28].mxu1 %vm1880_vm6, %v4582_v25 }
 0x8b3   :  { %5343 = vmatprep.mubr.msk.f32.mxu1 %vm1880_vm6, %v1797_v26 }
 0x8b5   :  { %v2142_v29 = vpop.f32.mrb[28].mxu0 }
 0x8b6   :  { %v5359_v30 = vpop.f32.mrb[29].mxu0  ;;  %5344 = vmatmul.mubr.msk.f32.vlgmr.msra.gmra.mrb[18].mxu1 %vm1880_vm6, %v1798_v27 }
 0x8b7   :  { %v2145_v31 = vpop.f32.mrb[30].mxu0  ;;  %5346 = vmatprep.mubr.msk.f32.mxu1 %vm1880_vm6, %v1799_v28 }
 0x8b8   :  { %v5751_v33 = vpack.c.bf16 %v2145_v31, %v2142_v29  ;;  %v5360_v34 = vpop.f32.mrb[31].mxu0 }
 0x8ba   :  { %5752 = vmatprep.subr.bf16.mxu1 %v5751_v33  ;;  %5347 = vmatmul.mubr.msk.f32.gmra.mrb[28].mxu1 %vm1880_vm6, %v1800_v32 }
 0x8bb   :  { %5754 = vmatpush3.bf16.msra.mxu1 %v5751_v33  ;;  %5365 = vmatprep.mubr.msk.f32.mxu1 %vm1880_vm6, %v4604_v36 }
 0x8bc   :  { %5371 = vmatprep.subr.bf16.mxu1 %v6166_v0 }
 0x8be   :  { %5366 = vmatmul.mubr.msk.f32.vlgmr.msra.gmra.mrb[18].mxu1 %vm1880_vm6, %v4605_v37 }
 0x8bf   :  { %5372 = vmatpush3.bf16.msra.mxu1 %v5952_v38  ;;  %5368 = vmatprep.mubr.msk.f32.mxu1 %vm1880_vm6, %v4606_v39  ;;  %v5956_v38 = vld [vmem:[%s7280_s8 + $0x20] sm:$0xff]   ;;  %v5959_v39 = vld [vmem:[%s7280_s8 + $0x8] sm:$0xff]  }
 0x8c0   :  { %5373 = vmatprep.subr.bf16.mxu1 %v6166_v0 }
 0x8c2   :  { %5369 = vmatmul.mubr.msk.f32.gmra.mrb[28].mxu1 %vm1880_vm6, %v4607_v41  ;;  %v5961_v41 = vld [vmem:[%s7280_s8 + $0x10] sm:$0xff]  }
 0x8c3   :  { %5374 = vmatpush3.bf16.msra.mxu1 %v5953_v40  ;;  %5379 = vmatprep.mubr.msk.bf16.mxu1 %vm6167_vm0, %v6166_v0  ;;  %v5960_v40 = vld [vmem:[%s7280_s8 + $0x30] sm:$0xff]  }
 0x8c4   :  { %5375 = vmatprep.subr.bf16.mxu1 %v6166_v0 }
 0x8c7   :  { %5376 = vmatpush3.bf16.msra.mxu1 %v5954_v42  ;;  %v5962_v42 = vld [vmem:[%s7280_s8 + $0x38] sm:$0xff]  }
 0x8c8   :  { %5377 = vmatprep.subr.bf16.mxu1 %v6166_v0 }
 0x8cb   :  { %5378 = vmatpush3.bf16.msra.mxu1 %v5955_v43  ;;  %v5963_v43 = vld [vmem:[%s7280_s8 + $0x18] sm:$0xff]  }
 0x8ce   :  { %5380 = vmatmul.mubr.msk.bf16.vlgmr.msra.gmra.mrb[32].mxu1 %vm686_vm4, %v6692_v7 }
 0x8cf   :  { %5387 = vmatprep.mubr.msk.f32.mxu1 %vm1880_vm6, %v4625_v44  ;;  %v5964_v44 = vld [vmem:[%s7280_s8 + $0x40] sm:$0xff]  }
 0x9a1   :  { %v2322_v45 = vpop.f32.mrb[32].mxu1 }
 0x9a2   :  { %v5381_v46 = vpop.f32.mrb[33].mxu1 }
 0x9a3   :  { %v2325_v47 = vpop.f32.mrb[34].mxu1 }
 0x9a4   :  { %v5755_v48 = vpack.c.bf16 %v2325_v47, %v2322_v45  ;;  %v5382_v49 = vpop.f32.mrb[35].mxu1 }
 0x9a6   :  { %5756 = vmatprep.subr.bf16.mxu1 %v5755_v48 }
 0x9a7   :  { %5758 = vmatpush3.bf16.msra.mxu1 %v5755_v48 }
 0x9aa   :  { %5388 = vmatmul.mubr.msk.f32.vlgmr.msra.gmra.mrb[18].mxu1 %vm1880_vm6, %v4626_v50 }
 0x9ab   :  { %5390 = vmatprep.mubr.msk.f32.mxu1 %vm1880_vm6, %v4627_v51 }
 0x9ae   :  { %5391 = vmatmul.mubr.msk.f32.gmra.mrb[28].mxu1 %vm1880_vm6, %v4628_v52 }
 0xa7d   :  { %v6829_v2 = vpop.f32.mrb[18].mxu1 }
 0xa7e   :  { %v2436_v3 = vsel %vm686_vm4, %v6829_v2, 0.0  ;;  %v2449_v4 = vmul.f32 %v6829_v2, %v6829_v2  ;;  %v6835_v5 = vpop.f32.mrb[19].mxu1 }
 0xa7f   :  { %v2435_v6 = vsel %vm686_vm4, %v6835_v5, 0.0  ;;  %v2448_v7 = vmul.f32 %v6835_v5, %v6835_v5 }
 0xa80   :  { %v2453_v8 = vsel %vm686_vm4, %v2449_v4, 0.0  ;;  %v2437_v9 = vadd.f32 %v2436_v3, %v2435_v6 }
 0xa81   :  { %v2452_v10 = vsel %vm686_vm4, %v2448_v7, 0.0  ;;  %v6843_v11 = vpop.f32.mrb[28].mxu1 }
 0xa82   :  { %v2454_v12 = vadd.f32 %v2453_v8, %v2452_v10  ;;  %v6845_v13 = vpop.f32.mrb[29].mxu1  ;;  %v2451_v14 = vmul.f32 %v6843_v11, %v6843_v11  ;;  %v2440_v18 = vsel %vm686_vm4, %v6843_v11, 0.0 }
 0xa83   :  { %v2438_v15 = vsel %vm686_vm4, %v6845_v13, 0.0  ;;  %v2450_v16 = vmul.f32 %v6845_v13, %v6845_v13 }
 0xa84   :  { %v2439_v17 = vadd.f32 %v2438_v15, %v2437_v9  ;;  %v2457_v23 = vsel %vm686_vm4, %v2451_v14, 0.0 }
 0xa85   :  { %v2455_v19 = vsel %vm686_vm4, %v2450_v16, 0.0 }
 0xa86   :  { %v2441_v21 = vadd.f32 %v2440_v18, %v2439_v17  ;;  %v2456_v22 = vadd.f32 %v2455_v19, %v2454_v12  ;;  %v5970_v17 = vld [vmem:[%s7280_s8 + $0x70] sm:$0xff]   ;;  %v5971_v18 = vld [vmem:[%s7280_s8 + $0x78] sm:$0xff]   ;;  %v4655_v19 = vld [vmem:[%s7279_s7 + $0x40] sm:$0xff] }
 0xa88   :  { %v2442_v24 = vrot.slane %v2441_v21, 4  ;;  %v2458_v25 = vadd.f32 %v2457_v23, %v2456_v22 }
 0xa8a   :  { %v2443_v26 = vadd.f32 %v2442_v24, %v2441_v21  ;;  %v2459_v29 = vrot.slane %v2458_v25, 4 }
 0xa8c   :  { %v2444_v27 = vrot.slane %v2443_v26, 2  ;;  %v2460_v31 = vadd.f32 %v2459_v29, %v2458_v25 }
 0xa8e   :  { %v2445_v28 = vadd.f32 %v2444_v27, %v2443_v26  ;;  %v2461_v33 = vrot.slane %v2460_v31, 2 }
 0xa90   :  { %v2446_v30 = vrot.slane %v2445_v28, 1  ;;  %v2462_v34 = vadd.f32 %v2461_v33, %v2460_v31  ;;  %v4656_v33 = vld [vmem:[%s7279_s7 + $0x48] sm:$0xff] }
 0xa92   :  { %v2447_v32 = vadd.f32 %v2446_v30, %v2445_v28  ;;  %v2463_v36 = vrot.slane %v2462_v34, 1 }
 0xa94   :  { %5410 = vmatmul.mubr.msk.f32.vlgmr.msra.gmra.mrb[32].mxu0 %vm686_vm4, %v2447_v32  ;;  %v2464_v37 = vadd.f32 %v2463_v36, %v2462_v34  ;;  %v4657_v34 = vld [vmem:[%s7279_s7 + $0x50] sm:$0xff]  ;;  %v4658_v36 = vld [vmem:[%s7279_s7 + $0x58] sm:$0xff] }
 0xa95   :  { %5773 = vmatpush3.bf16.msra.mxu0 %v5760_v55  ;;  %5428 = vmatprep.mubr.msk.f32.mxu0 %vm6167_vm0, %v6166_v0  ;;  %v5957_v0 = vld [vmem:[%s7280_s8] sm:$0xff]  }
 0xa96   :  { %5774 = vmatprep.subr.bf16.mxu0 %v6168_v35  ;;  %5431 = vmatprep.subr.bf16.mxu1 %v5957_v0 }
 0xa97   :  { %5432 = vmatpush3.bf16.msra.mxu1 %v5957_v0 }
 0xa98   :  { %5433 = vmatprep.subr.bf16.mxu1 %v5959_v39 }
 0xa99   :  { %5776 = vmatpush3.bf16.msra.mxu0 %v5763_v58 }
 0xa9a   :  { %5777 = vmatprep.subr.bf16.mxu0 %v6168_v35 }
 0xa9b   :  { %5434 = vmatpush3.bf16.msra.mxu1 %v5959_v39 }
 0xa9c   :  { %5435 = vmatprep.subr.bf16.mxu1 %v5961_v41 }
 0xa9d   :  { %5779 = vmatpush3.bf16.msra.mxu0 %v5766_v61 }
 0xa9e   :  { %5780 = vmatprep.subr.bf16.mxu0 %v6168_v35  ;;  %v5958_v35 = vld [vmem:[%s7280_s8 + $0x28] sm:$0xff]  }
 0xa9f   :  { %5436 = vmatpush3.bf16.msra.mxu1 %v5961_v41  ;;  %v4660_v41 = vld [vmem:[%s7279_s7 + $0x68] sm:$0xff] }
 0xaa0   :  { %5437 = vmatprep.subr.bf16.mxu1 %v5963_v43 }
 0xaa1   :  { %5782 = vmatpush3.bf16.msra.mxu0 %v5769_v1 }
 0xaa2   :  { %5443 = vmatprep.subr.bf16.mxu0 %v5956_v38 }
 0xaa3   :  { %5438 = vmatpush3.bf16.msra.mxu1 %v5963_v43  ;;  %v4661_v43 = vld [vmem:[%s7279_s7 + $0x70] sm:$0xff] }
 0xaa4   :  { %5429 = vmatmul.mubr.msk.f32.vlgmr.msra.gmra.mrb[34].mxu0 %vm686_vm4, %v2464_v37 }
 0xaa5   :  { %5444 = vmatpush3.bf16.msra.mxu0 %v5956_v38  ;;  %v4659_v38 = vld [vmem:[%s7279_s7 + $0x60] sm:$0xff] }
 0xaa6   :  { %5445 = vmatprep.subr.bf16.mxu0 %v5958_v35 }
 0xaa9   :  { %5446 = vmatpush3.bf16.msra.mxu0 %v5958_v35 }
 0xaaa   :  { %5447 = vmatprep.subr.bf16.mxu0 %v5960_v40 }
 0xaad   :  { %5448 = vmatpush3.bf16.msra.mxu0 %v5960_v40 }
 0xaae   :  { %5449 = vmatprep.subr.bf16.mxu0 %v5962_v42 }
 0xab1   :  { %5450 = vmatpush3.bf16.msra.mxu0 %v5962_v42 }
 0xab2   :  { %5495 = vmatprep.subr.bf16.mxu0 %v5964_v44 }
 0xb67   :  { %v2542_v45 = vpop.f32.mrb[32].mxu0 }
 0xb68   :  { %v5411_v46 = vpop.f32.mrb[33].mxu0  ;;  %v2546_v47 = vmul.f32 0.001953125, %v2542_v45  ;;  %v2743_v45 = vld [vmem:[%s7279_s7] sm:$0xff] }
 0xb69   :  { %v2744_v46 = vld [vmem:[%s7279_s7 + $0x8] sm:$0xff] }
 0xb6a   :  { %v2621_v49 = vmul.f32 %v2546_v47, %v2546_v47 }
 0xb77   :  { %v2616_v48 = vpop.f32.mrb[34].mxu0 }
 0xb78   :  { %v2620_v50 = vmul.f32 0.001953125, %v2616_v48  ;;  %v5430_v51 = vpop.f32.mrb[35].mxu0  ;;  %v2746_v48 = vld [vmem:[%s7279_s7 + $0x18] sm:$0xff] }
 0xb7a   :  { %v2622_v52 = vsub.f32 %v2620_v50, %v2621_v49  ;;  %v2747_v50 = vld [vmem:[%s7279_s7 + $0x20] sm:$0xff] }
 0xb7c   :  { %v2624_v53 = vadd.f32 1e-05, %v2622_v52 }
 0xb7e   :  { %5976 = vrsqrt.f32 %v2624_v53 }
 0xb88   :  { %v5977_v55 = vpop.eup %5976 }
 0xb89   :  { %v2626_v56 = vmul.f32 %v5977_v55, %v2623_v54  ;;  %v2748_v55 = vld [vmem:[%s7279_s7 + $0x28] sm:$0xff] }
 0xb8b   :  { %v2628_v58 = vmul.f32 %v2626_v56, %v2546_v47  ;;  %v2634_v59 = vrot.slane %v2626_v56, %v6520_v20  ;;  %v2745_v47 = vld [vmem:[%s7279_s7 + $0x10] sm:$0xff] }
 0xb8d   :  { %v2629_v60 = vsub.f32 %v2627_v57, %v2628_v58  ;;  %v2636_v61 = vmul.f32 %v2634_v59, %v6835_v5  ;;  %v2637_v62 = vmul.f32 %v6829_v2, %v2634_v59  ;;  %v2638_v63 = vmul.f32 %v2634_v59, %v6845_v13  ;;  %v5965_v2 = vld [vmem:[%s7280_s8 + $0x48] sm:$0xff]   ;;  %v5967_v5 = vld [vmem:[%s7280_s8 + $0x58] sm:$0xff]   ;;  %v2749_v57 = vld [vmem:[%s7279_s7 + $0x30] sm:$0xff] }
 0xb8e   :  { %v2639_v1 = vmul.f32 %v6843_v11, %v2634_v59  ;;  %v5968_v11 = vld [vmem:[%s7280_s8 + $0x60] sm:$0xff]   ;;  %v5969_v13 = vld [vmem:[%s7280_s8 + $0x68] sm:$0xff]   ;;  %v2750_v58 = vld [vmem:[%s7279_s7 + $0x38] sm:$0xff] }
 0xb8f   :  { %v2644_v3 = vrot.slane %v2629_v60, %v6520_v20  ;;  %v5966_v20 = vld [vmem:[%s7280_s8 + $0x50] sm:$0xff]   ;;  %v4693_v59 = vld [vmem:[%s7279_s7 + $0x80] sm:$0xff]  ;;  %v4694_v60 = vld [vmem:[%s7279_s7 + $0x88] sm:$0xff] }
 0xb91   :  { %v2646_v4 = vadd.f32 %v2644_v3, %v2636_v61  ;;  %v2647_v6 = vadd.f32 %v2644_v3, %v2637_v62  ;;  %v2648_v7 = vadd.f32 %v2644_v3, %v2638_v63  ;;  %v2649_v8 = vadd.f32 %v2644_v3, %v2639_v1  ;;  %v4695_v61 = vld [vmem:[%s7279_s7 + $0x90] sm:$0xff]  ;;  %v4696_v62 = vld [vmem:[%s7279_s7 + $0x98] sm:$0xff]  ;;  %v4697_v63 = vld [vmem:[%s7279_s7 + $0xa0] sm:$0xff] }
 0xb92   :  { %v4698_v1 = vld [vmem:[%s7279_s7 + $0xa8] sm:$0xff]  ;;  %v4699_v3 = vld [vmem:[%s7279_s7 + $0xb0] sm:$0xff] }
 0xb93   :  { %v2650_v9 = vmax.f32 %v2646_v4, 0.0  ;;  %v2651_v10 = vmax.f32 %v2647_v6, 0.0  ;;  %v2652_v12 = vmax.f32 %v2648_v7, 0.0  ;;  %v2653_v14 = vmax.f32 %v2649_v8, 0.0  ;;  %v4700_v4 = vld [vmem:[%s7279_s7 + $0xb8] sm:$0xff]  ;;  %v4723_v6 = vld [vmem:[%s7279_s7 + $0xc0] sm:$0xff] }
 0xb94   :  { %v4724_v7 = vld [vmem:[%s7279_s7 + $0xc8] sm:$0xff]  ;;  %v4725_v8 = vld [vmem:[%s7279_s7 + $0xd0] sm:$0xff] }
 0xb95   :  { %v2654_v15 = vpack.c.bf16 %v2651_v10, %v2650_v9  ;;  %v2655_v16 = vpack.c.bf16 %v2653_v14, %v2652_v12  ;;  %v4726_v9 = vld [vmem:[%s7279_s7 + $0xd8] sm:$0xff]  ;;  %v4727_v10 = vld [vmem:[%s7279_s7 + $0xe0] sm:$0xff]  ;;  %v4728_v12 = vld [vmem:[%s7279_s7 + $0xe8] sm:$0xff] }
 0xb96   :  { %v4729_v14 = vld [vmem:[%s7279_s7 + $0xf0] sm:$0xff] }
 0xb97   :  { %5439 = vmatprep.mubr.msk.bf16.mxu1 %vm686_vm4, %v2654_v15  ;;  %5451 = vmatprep.mubr.msk.bf16.mxu0 %vm686_vm4, %v2654_v15 }
 0xb98   :  { %5440 = vmatmul.mubr.msk.bf16.vlgmr.msra.gmra.mrb[36].mxu1 %vm686_vm4, %v2655_v16  ;;  %5452 = vmatmul.mubr.msk.bf16.vlgmr.msra.gmra.mrb[36].mxu0 %vm686_vm4, %v2655_v16 }
 0xb99   :  { %5496 = vmatpush3.bf16.msra.mxu0 %v5964_v44  ;;  %5503 = vmatprep.mubr.msk.bf16.mxu0 %vm686_vm4, %v2654_v15  ;;  %v4662_v44 = vld [vmem:[%s7279_s7 + $0x78] sm:$0xff] }
 0xb9a   :  { %5497 = vmatprep.subr.bf16.mxu0 %v5965_v2  ;;  %5463 = vmatprep.mubr.msk.f32.mxu1 %vm156_vm1, %v4655_v19 }
 0xb9d   :  { %5498 = vmatpush3.bf16.msra.mxu0 %v5965_v2  ;;  %v3773_v2 = vld [vmem:[#allocation11] sm:$0xff] }
 0xb9e   :  { %5499 = vmatprep.subr.bf16.mxu0 %v5966_v20 }
 0xba1   :  { %5500 = vmatpush3.bf16.msra.mxu0 %v5966_v20  ;;  %v3774_v20 = vld [vmem:[#allocation11 + $0x8] sm:$0xff] }
 0xba2   :  { %5501 = vmatprep.subr.bf16.mxu0 %v5967_v5 }
 0xba5   :  { %5502 = vmatpush3.bf16.msra.mxu0 %v5967_v5  ;;  %v7061_v5 = vpack.c.bf16 %v3774_v20, %v3773_v2 }
 0xba6   :  { %5527 = vmatprep.subr.bf16.mxu0 %v5968_v11 }
 0xba8   :  { %5504 = vmatmul.mubr.msk.bf16.vlgmr.msra.gmra.mrb[40].mxu0 %vm686_vm4, %v2655_v16 }
 0xba9   :  { %5528 = vmatpush3.bf16.msra.mxu0 %v5968_v11  ;;  %5535 = vmatprep.mubr.msk.bf16.mxu0 %vm686_vm4, %v2654_v15  ;;  %v4730_v15 = vld [vmem:[%s7279_s7 + $0xf8] sm:$0xff] }
 0xbaa   :  { %5529 = vmatprep.subr.bf16.mxu0 %v5969_v13 }
 0xbad   :  { %5530 = vmatpush3.bf16.msra.mxu0 %v5969_v13 }
 0xbae   :  { %5531 = vmatprep.subr.bf16.mxu0 %v5970_v17 }
 0xbb1   :  { %5532 = vmatpush3.bf16.msra.mxu0 %v5970_v17 }
 0xbb2   :  { %5533 = vmatprep.subr.bf16.mxu0 %v5971_v18 }
 0xbb5   :  { %5534 = vmatpush3.bf16.msra.mxu0 %v5971_v18 }
 0xbb8   :  { %5536 = vmatmul.mubr.msk.bf16.vlgmr.msra.gmra.mrb[44].mxu0 %vm686_vm4, %v2655_v16  ;;  %v3564_v16 = vld [vmem:[%s7290_s18] sm:$0xff] }
 0xbb9   :  { %5575 = vmatprep.mubr.msk.f32.mxu0 %vm686_vm4, %v3564_v16 }
 0xc6b   :  { %v5441_v21 = vpop.f32.mrb[36].mxu1  ;;  %v5453_v22 = vpop.f32.mrb[36].mxu0 }
 0xc6c   :  { %v2728_v23 = vpop.f32.mrb[37].mxu1  ;;  %v2818_v24 = vpop.f32.mrb[37].mxu0 }
 0xc6d   :  { %v5442_v25 = vpop.f32.mrb[38].mxu1  ;;  %v5454_v26 = vpop.f32.mrb[38].mxu0 }
 0xc6e   :  { %v5795_v27 = vpack.c.bf16 %v5442_v25, %v5441_v21  ;;  %v5787_v28 = vpack.c.bf16 %v5454_v26, %v5453_v22  ;;  %v2731_v29 = vpop.f32.mrb[39].mxu1  ;;  %v2821_v30 = vpop.f32.mrb[39].mxu0 }
 0xc6f   :  { %v5791_v31 = vpack.c.bf16 %v2731_v29, %v2728_v23  ;;  %v5783_v32 = vpack.c.bf16 %v2821_v30, %v2818_v24 }
 0xc71   :  { %5784 = vmatprep.subr.bf16.mxu1 %v5783_v32 }
 0xc72   :  { %5786 = vmatpush3.bf16.msra.mxu1 %v5783_v32 }
 0xc73   :  { %5788 = vmatprep.subr.bf16.mxu1 %v5787_v28 }
 0xc76   :  { %5790 = vmatpush3.bf16.msra.mxu1 %v5787_v28 }
 0xc77   :  { %5792 = vmatprep.subr.bf16.mxu1 %v5791_v31 }
 0xc79   :  { %5464 = vmatmul.mubr.msk.f32.vlgmr.msra.gmra.mrb[30].mxu1 %vm156_vm1, %v4656_v33 }
 0xc7a   :  { %5794 = vmatpush3.bf16.msra.mxu1 %v5791_v31  ;;  %5466 = vmatprep.mubr.msk.f32.mxu1 %vm156_vm1, %v4657_v34 }
 0xc7b   :  { %v5505_v37 = vpop.f32.mrb[40].mxu0  ;;  %5796 = vmatprep.subr.bf16.mxu1 %v5795_v27 }
 0xc7c   :  { %v3167_v0 = vpop.f32.mrb[41].mxu0 }
 0xc7d   :  { %v5506_v35 = vpop.f32.mrb[42].mxu0  ;;  %5467 = vmatmul.mubr.msk.f32.gmra.mrb[40].mxu1 %vm156_vm1, %v4658_v36 }
 0xc7e   :  { %v5803_v39 = vpack.c.bf16 %v5506_v35, %v5505_v37  ;;  %v3170_v40 = vpop.f32.mrb[43].mxu0  ;;  %5798 = vmatpush3.bf16.msra.mxu1 %v5795_v27  ;;  %5469 = vmatprep.mubr.msk.f32.mxu1 %vm156_vm1, %v4659_v38  ;;  %v3565_v37 = vld [vmem:[%s7290_s18 + $0x8] sm:$0xff]  ;;  %v3566_v38 = vld [vmem:[%s7290_s18 + $0x10] sm:$0xff]  ;;  %v3568_v35 = vld [vmem:[%s7290_s18 + $0x20] sm:$0xff] }
 0xc7f   :  { %v5799_v42 = vpack.c.bf16 %v3170_v40, %v3167_v0  ;;  %v3567_v0 = vld [vmem:[%s7290_s18 + $0x18] sm:$0xff]  ;;  %v3570_v40 = vld [vmem:[%s7290_s18 + $0x30] sm:$0xff] }
 0xc81   :  { %5800 = vmatprep.subr.bf16.mxu1 %v5799_v42  ;;  %5470 = vmatmul.mubr.msk.f32.gmra.mrb[42].mxu1 %vm156_vm1, %v4660_v41  ;;  %v3571_v41 = vld [vmem:[%s7290_s18 + $0x38] sm:$0xff] }
 0xc82   :  { %5472 = vmatprep.mubr.msk.f32.mxu1 %vm156_vm1, %v4661_v43  ;;  %v3573_v43 = vld [vmem:[%s7290_s18 + $0x48] sm:$0xff] }
 0xc85   :  { %5473 = vmatmul.mubr.msk.f32.gmra.mrb[44].mxu1 %vm156_vm1, %v4662_v44  ;;  %v3574_v44 = vld [vmem:[%s7290_s18 + $0x50] sm:$0xff] }
 0xc86   :  { %5483 = vmatprep.mubr.msk.f32.mxu1 %vm156_vm1, %v2743_v45  ;;  %v3575_v45 = vld [vmem:[%s7290_s18 + $0x58] sm:$0xff] }
 0xc89   :  { %5484 = vmatmul.mubr.msk.f32.vlgmr.msra.gmra.mrb[30].mxu1 %vm156_vm1, %v2744_v46  ;;  %v3576_v46 = vld [vmem:[%s7290_s18 + $0x60] sm:$0xff] }
 0xc8a   :  { %5802 = vmatpush3.bf16.msra.mxu1 %v5799_v42  ;;  %5486 = vmatprep.mubr.msk.f32.mxu1 %vm156_vm1, %v2745_v47  ;;  %v3572_v42 = vld [vmem:[%s7290_s18 + $0x40] sm:$0xff]  ;;  %v3577_v47 = vld [vmem:[%s7290_s18 + $0x68] sm:$0xff] }
 0xc8b   :  { %5804 = vmatprep.subr.bf16.mxu1 %v5803_v39  ;;  %v5537_v49 = vpop.f32.mrb[44].mxu0 }
 0xc8c   :  { %v3395_v51 = vpop.f32.mrb[45].mxu0 }
 0xc8d   :  { %v5538_v52 = vpop.f32.mrb[46].mxu0  ;;  %5487 = vmatmul.mubr.msk.f32.gmra.mrb[40].mxu1 %vm156_vm1, %v2746_v48  ;;  %v3578_v48 = vld [vmem:[%s7290_s18 + $0x70] sm:$0xff] }
 0xc8e   :  { %v5811_v53 = vpack.c.bf16 %v5538_v52, %v5537_v49  ;;  %5806 = vmatpush3.bf16.msra.mxu1 %v5803_v39  ;;  %v3398_v54 = vpop.f32.mrb[47].mxu0  ;;  %5489 = vmatprep.mubr.msk.f32.mxu1 %vm156_vm1, %v2747_v50  ;;  %v3569_v39 = vld [vmem:[%s7290_s18 + $0x28] sm:$0xff]  ;;  %v3579_v49 = vld [vmem:[%s7290_s18 + $0x78] sm:$0xff]  ;;  %s6170_s18 = smov 64  }
 0xc8f   :  { %v5807_v56 = vpack.c.bf16 %v3398_v54, %v3395_v51  ;;  %v3775_v50 = vld [vmem:[#allocation11 + $0x10] sm:$0xff]  ;;  %v3776_v51 = vld [vmem:[#allocation11 + $0x18] sm:$0xff] }
 0xc90   :  { %v5835_v52 = vpack.c.bf16 %v3776_v51, %v3775_v50 }
 0xc91   :  { %5808 = vmatprep.subr.bf16.mxu1 %v5807_v56  ;;  %5490 = vmatmul.mubr.msk.f32.gmra.mrb[42].mxu1 %vm156_vm1, %v2748_v55 }
 0xc92   :  { %5492 = vmatprep.mubr.msk.f32.mxu1 %vm156_vm1, %v2749_v57 }
 0xc95   :  { %5493 = vmatmul.mubr.msk.f32.gmra.mrb[44].mxu1 %vm156_vm1, %v2750_v58 }
 0xc96   :  { %5515 = vmatprep.mubr.msk.f32.mxu1 %vm156_vm1, %v4693_v59 }
 0xc99   :  { %5516 = vmatmul.mubr.msk.f32.vlgmr.msra.gmra.mrb[30].mxu1 %vm156_vm1, %v4694_v60 }
 0xc9a   :  { %5810 = vmatpush3.bf16.msra.mxu1 %v5807_v56  ;;  %5518 = vmatprep.mubr.msk.f32.mxu1 %vm156_vm1, %v4695_v61 }
 0xc9b   :  { %5812 = vmatprep.subr.bf16.mxu1 %v5811_v53 }
 0xc9d   :  { %5519 = vmatmul.mubr.msk.f32.gmra.mrb[40].mxu1 %vm156_vm1, %v4696_v62 }
 0xc9e   :  { %5814 = vmatpush3.bf16.msra.mxu1 %v5811_v53  ;;  %5521 = vmatprep.mubr.msk.f32.mxu1 %vm156_vm1, %v4697_v63 }
 0xc9f   :  { %5832 = vmatprep.subr.bf16.mxu1 %v7061_v5 }
 0xca1   :  { %5522 = vmatmul.mubr.msk.f32.gmra.mrb[42].mxu1 %vm156_vm1, %v4698_v1 }
 0xca2   :  { %5524 = vmatprep.mubr.msk.f32.mxu1 %vm156_vm1, %v4699_v3 }
 0xca5   :  { %5525 = vmatmul.mubr.msk.f32.gmra.mrb[44].mxu1 %vm156_vm1, %v4700_v4 }
 0xca6   :  { %5547 = vmatprep.mubr.msk.f32.mxu1 %vm156_vm1, %v4723_v6 }
 0xca9   :  { %5548 = vmatmul.mubr.msk.f32.vlgmr.msra.gmra.mrb[30].mxu1 %vm156_vm1, %v4724_v7 }
 0xcaa   :  { %5550 = vmatprep.mubr.msk.f32.mxu1 %vm156_vm1, %v4725_v8  ;;  %5834 = vmatpush3.bf16.msra.mxu1 %v7061_v5 }
 0xcab   :  { %5836 = vmatprep.subr.bf16.mxu1 %v5835_v52 }
 0xcad   :  { %5551 = vmatmul.mubr.msk.f32.gmra.mrb[40].mxu1 %vm156_vm1, %v4726_v9 }
 0xcae   :  { %5553 = vmatprep.mubr.msk.f32.mxu1 %vm156_vm1, %v4727_v10  ;;  %5838 = vmatpush3.bf16.msra.mxu1 %v5835_v52 }
 0xcaf   :  { %5848 = vmatprep.subr.bf16.mxu1 %v7061_v5 }
 0xcb1   :  { %5554 = vmatmul.mubr.msk.f32.gmra.mrb[42].mxu1 %vm156_vm1, %v4728_v12 }
 0xcb2   :  { %5556 = vmatprep.mubr.msk.f32.mxu1 %vm156_vm1, %v4729_v14 }
 0xcb5   :  { %5557 = vmatmul.mubr.msk.f32.gmra.mrb[44].mxu1 %vm156_vm1, %v4730_v15 }
 0xd7c   :  { %v5549_v11 = vpop.f32.mrb[30].mxu1 }
 0xd7d   :  { %5978 = vtanh.f32 %v5549_v11  ;;  %v3509_v13 = vpop.f32.mrb[31].mxu1 }
 0xd7e   :  { %5980 = vtanh.f32 %v3509_v13 }
 0xd80   :  { %v5552_v17 = vpop.f32.mrb[40].mxu1 }
 0xd81   :  { %5982 = vtanh.f32 %v5552_v17  ;;  %v3519_v18 = vpop.f32.mrb[41].mxu1 }
 0xd82   :  { %5984 = vtanh.f32 %v3519_v18 }
 0xd84   :  { %v5555_v19 = vpop.f32.mrb[42].mxu1 }
 0xd85   :  { %5986 = vtanh.f32 %v5555_v19  ;;  %v3529_v21 = vpop.f32.mrb[43].mxu1 }
 0xd86   :  { %5988 = vtanh.f32 %v3529_v21 }
 0xd87   :  { %v5979_v22 = vpop.eup %5978 }
 0xd88   :  { %v5981_v23 = vpop.eup %5980  ;;  %v5558_v24 = vpop.f32.mrb[44].mxu1 }
 0xd89   :  { %5990 = vtanh.f32 %v5558_v24  ;;  %v3539_v25 = vpop.f32.mrb[45].mxu1  ;;  %v5815_v26 = vpack.c.bf16 %v5979_v22, %v5981_v23 }
 0xd8a   :  { %5992 = vtanh.f32 %v3539_v25 }
 0xd8b   :  { %v5983_v27 = vpop.eup %5982  ;;  %5816 = vmatprep.subr.bf16.mxu0 %v5815_v26 }
 0xd8c   :  { %v5985_v28 = vpop.eup %5984  ;;  %5818 = vmatpush3.bf16.msra.mxu0 %v5815_v26 }
 0xd8d   :  { %v5819_v29 = vpack.c.bf16 %v5983_v27, %v5985_v28 }
 0xd8f   :  { %v5987_v30 = vpop.eup %5986  ;;  %5820 = vmatprep.subr.bf16.mxu0 %v5819_v29 }
 0xd90   :  { %v5989_v31 = vpop.eup %5988  ;;  %5822 = vmatpush3.bf16.msra.mxu0 %v5819_v29 }
 0xd91   :  { %v5823_v32 = vpack.c.bf16 %v5987_v30, %v5989_v31 }
 0xd93   :  { %v5991_v33 = vpop.eup %5990  ;;  %5824 = vmatprep.subr.bf16.mxu0 %v5823_v32 }
 0xd94   :  { %v5993_v34 = vpop.eup %5992  ;;  %5826 = vmatpush3.bf16.msra.mxu0 %v5823_v32 }
 0xd95   :  { %v5827_v36 = vpack.c.bf16 %v5991_v33, %v5993_v34 }
 0xd97   :  { %5828 = vmatprep.subr.bf16.mxu0 %v5827_v36 }
 0xd98   :  { %5830 = vmatpush3.bf16.msra.mxu0 %v5827_v36 }
 0xd99   :  { %5840 = vmatprep.subr.bf16.mxu0 %v7061_v5 }
 0xd9b   :  { %5576 = vmatmul.mubr.msk.f32.vlgmr.msra.gmra.mrb[48].mxu0 %vm686_vm4, %v3565_v37 }
 0xd9c   :  { %5578 = vmatprep.mubr.msk.f32.mxu0 %vm686_vm4, %v3566_v38  ;;  %5842 = vmatpush3.bf16.msra.mxu0 %v7061_v5 }
 0xd9d   :  { %5844 = vmatprep.subr.bf16.mxu0 %v5835_v52 }
 0xd9f   :  { %5579 = vmatmul.mubr.msk.f32.gmra.mrb[50].mxu0 %vm686_vm4, %v3567_v0 }
 0xda0   :  { %5581 = vmatprep.mubr.msk.f32.mxu0 %vm686_vm4, %v3568_v35  ;;  %5846 = vmatpush3.bf16.msra.mxu0 %v5835_v52 }
 0xda3   :  { %5582 = vmatmul.mubr.msk.f32.gmra.mrb[52].mxu0 %vm686_vm4, %v3569_v39 }
 0xda4   :  { %5584 = vmatprep.mubr.msk.f32.mxu0 %vm686_vm4, %v3570_v40 }
 0xda7   :  { %5585 = vmatmul.mubr.msk.f32.gmra.mrb[54].mxu0 %vm686_vm4, %v3571_v41 }
 0xda8   :  { %5587 = vmatprep.mubr.msk.f32.mxu0 %vm686_vm4, %v3572_v42 }
 0xdab   :  { %5588 = vmatmul.mubr.msk.f32.gmra.mrb[56].mxu0 %vm686_vm4, %v3573_v43 }
 0xdac   :  { %5590 = vmatprep.mubr.msk.f32.mxu0 %vm686_vm4, %v3574_v44 }
 0xdaf   :  { %5591 = vmatmul.mubr.msk.f32.gmra.mrb[58].mxu0 %vm686_vm4, %v3575_v45 }
 0xdb0   :  { %5593 = vmatprep.mubr.msk.f32.mxu0 %vm686_vm4, %v3576_v46 }
 0xdb3   :  { %5594 = vmatmul.mubr.msk.f32.gmra.mrb[60].mxu0 %vm686_vm4, %v3577_v47 }
 0xdb4   :  { %5596 = vmatprep.mubr.msk.f32.mxu0 %vm686_vm4, %v3578_v48 }
 0xdb7   :  { %5597 = vmatmul.mubr.msk.f32.gmra.mrb[62].mxu0 %vm686_vm4, %v3579_v49 }
 0xe6e   :  { %v5577_v53 = vpop.f32.mrb[48].mxu0 }
 0xe6f   :  { %v3694_v54 = vpop.f32.mrb[49].mxu0  ;;  %3992 = vrot.lane.b32.xlu1 %v5577_v53, %s6169_s9 }
 0xe70   :  { %3990 = vrot.lane.b32.xlu0 %v3694_v54, %s6169_s9  ;;  %5607 = vmatprep.mubr.msk.f32.mxu1 %vm156_vm1, %v3694_v54 }
 0xe71   :  { %5608 = vmatmul.mubr.msk.f32.vlgmr.msra.gmra.mrb[46].mxu1 %vm156_vm1, %v5577_v53 }
 0xe72   :  { %v5580_v55 = vpop.f32.mrb[50].mxu0  ;;  %5850 = vmatpush3.bf16.msra.mxu1 %v7061_v5 }
 0xe73   :  { %4221 = vrot.lane.b32.xlu1 %v5577_v53, %s6170_s18  ;;  %v3704_v56 = vpop.f32.mrb[51].mxu0  ;;  %5852 = vmatprep.subr.bf16.mxu1 %v5835_v52 }
 0xe74   :  { %4219 = vrot.lane.b32.xlu0 %v3694_v54, %s6170_s18  ;;  %5610 = vmatprep.mubr.msk.f32.mxu1 %vm156_vm1, %v3704_v56 }
 0xe75   :  { %5611 = vmatmul.mubr.msk.f32.gmra.mrb[48].mxu1 %vm156_vm1, %v5580_v55 }
 0xe76   :  { %v5583_v57 = vpop.f32.mrb[52].mxu0  ;;  %5854 = vmatpush3.bf16.msra.mxu1 %v5835_v52 }
 0xe77   :  { %4225 = vrot.lane.b32.xlu1 %v5580_v55, %s6170_s18  ;;  %v3714_v58 = vpop.f32.mrb[53].mxu0 }
 0xe78   :  { %3996 = vrot.lane.b32.xlu0 %v5580_v55, %s6169_s9  ;;  %5613 = vmatprep.mubr.msk.f32.mxu1 %vm156_vm1, %v3714_v58 }
 0xe79   :  { %5614 = vmatmul.mubr.msk.f32.gmra.mrb[50].mxu1 %vm156_vm1, %v5583_v57 }
 0xe7a   :  { %v5586_v59 = vpop.f32.mrb[54].mxu0 }
 0xe7b   :  { %4223 = vrot.lane.b32.xlu1 %v3704_v56, %s6170_s18  ;;  %v3724_v60 = vpop.f32.mrb[55].mxu0 }
 0xe7c   :  { %3994 = vrot.lane.b32.xlu0 %v3704_v56, %s6169_s9  ;;  %5616 = vmatprep.mubr.msk.f32.mxu1 %vm156_vm1, %v3724_v60 }
 0xe7d   :  { %5617 = vmatmul.mubr.msk.f32.gmra.mrb[52].mxu1 %vm156_vm1, %v5586_v59 }
 0xe7e   :  { %v5589_v61 = vpop.f32.mrb[56].mxu0 }
 0xe7f   :  { %4229 = vrot.lane.b32.xlu1 %v5583_v57, %s6170_s18  ;;  %v3734_v62 = vpop.f32.mrb[57].mxu0 }
 0xe80   :  { %4000 = vrot.lane.b32.xlu0 %v5583_v57, %s6169_s9  ;;  %5619 = vmatprep.mubr.msk.f32.mxu1 %vm156_vm1, %v3734_v62 }
 0xe81   :  { %5620 = vmatmul.mubr.msk.f32.gmra.mrb[54].mxu1 %vm156_vm1, %v5589_v61 }
 0xe82   :  { %v5592_v63 = vpop.f32.mrb[58].mxu0 }
 0xe83   :  { %4227 = vrot.lane.b32.xlu1 %v3714_v58, %s6170_s18  ;;  %v3744_v1 = vpop.f32.mrb[59].mxu0 }
 0xe84   :  { %3998 = vrot.lane.b32.xlu0 %v3714_v58, %s6169_s9  ;;  %5622 = vmatprep.mubr.msk.f32.mxu1 %vm156_vm1, %v3744_v1 }
 0xe85   :  { %5623 = vmatmul.mubr.msk.f32.gmra.mrb[56].mxu1 %vm156_vm1, %v5592_v63 }
 0xe86   :  { %v5595_v3 = vpop.f32.mrb[60].mxu0 }
 0xe87   :  { %4233 = vrot.lane.b32.xlu1 %v5586_v59, %s6170_s18  ;;  %v3754_v4 = vpop.f32.mrb[61].mxu0 }
 0xe88   :  { %4004 = vrot.lane.b32.xlu0 %v5586_v59, %s6169_s9  ;;  %5625 = vmatprep.mubr.msk.f32.mxu1 %vm156_vm1, %v3754_v4 }
 0xe89   :  { %5626 = vmatmul.mubr.msk.f32.gmra.mrb[58].mxu1 %vm156_vm1, %v5595_v3 }
 0xe8a   :  { %v5598_v6 = vpop.f32.mrb[62].mxu0 }
 0xe8b   :  { %4231 = vrot.lane.b32.xlu1 %v3724_v60, %s6170_s18  ;;  %v3764_v7 = vpop.f32.mrb[63].mxu0 }
 0xe8c   :  { %4002 = vrot.lane.b32.xlu0 %v3724_v60, %s6169_s9  ;;  %5628 = vmatprep.mubr.msk.f32.mxu1 %vm156_vm1, %v3764_v7 }
 0xe8d   :  { %5629 = vmatmul.mubr.msk.f32.gmra.mrb[60].mxu1 %vm156_vm1, %v5598_v6 }
 0xe8f   :  { %4237 = vrot.lane.b32.xlu1 %v5589_v61, %s6170_s18 }
 0xe90   :  { %4008 = vrot.lane.b32.xlu0 %v5589_v61, %s6169_s9 }
 0xe93   :  { %4235 = vrot.lane.b32.xlu1 %v3734_v62, %s6170_s18 }
 0xe94   :  { %4006 = vrot.lane.b32.xlu0 %v3734_v62, %s6169_s9 }
 0xe97   :  { %4241 = vrot.lane.b32.xlu1 %v5592_v63, %s6170_s18 }
 0xe98   :  { %4012 = vrot.lane.b32.xlu0 %v5592_v63, %s6169_s9 }
 0xe9b   :  { %4239 = vrot.lane.b32.xlu1 %v3744_v1, %s6170_s18 }
 0xe9c   :  { %4010 = vrot.lane.b32.xlu0 %v3744_v1, %s6169_s9 }
 0xe9f   :  { %4245 = vrot.lane.b32.xlu1 %v5595_v3, %s6170_s18 }
 0xea0   :  { %4016 = vrot.lane.b32.xlu0 %v5595_v3, %s6169_s9 }
 0xea3   :  { %4243 = vrot.lane.b32.xlu1 %v3754_v4, %s6170_s18 }
 0xea4   :  { %4014 = vrot.lane.b32.xlu0 %v3754_v4, %s6169_s9 }
 0xea7   :  { %4247 = vrot.lane.b32.xlu1 %v3764_v7, %s6170_s18 }
 0xea8   :  { %4018 = vrot.lane.b32.xlu0 %v3764_v7, %s6169_s9 }
 0xeab   :  { %4249 = vrot.lane.b32.xlu1 %v5598_v6, %s6170_s18 }
 0xeac   :  { %4020 = vrot.lane.b32.xlu0 %v5598_v6, %s6169_s9 }
 0xee1   :  { %v3993_v8 = vpop.permute.xlu1 %3992 }
 0xee2   :  { %v3991_v9 = vpop.permute.xlu0 %3990 }
 0xee3   :  { %5639 = vmatprep.mubr.msk.f32.mxu0 %vm156_vm1, %v3991_v9 }
 0xee4   :  { %5640 = vmatmul.mubr.msk.f32.vlgmr.msra.gmra.mrb[64].mxu0 %vm156_vm1, %v3993_v8 }
 0xee5   :  { %v4222_v10 = vpop.permute.xlu1 %4221 }
 0xee6   :  { %v4220_v12 = vpop.permute.xlu0 %4219 }
 0xee7   :  { %5671 = vmatprep.mubr.msk.f32.mxu1 %vm156_vm1, %v4220_v12 }
 0xee8   :  { %5672 = vmatmul.mubr.msk.f32.vlgmr.msra.gmra.mrb[62].mxu1 %vm156_vm1, %v4222_v10 }
 0xee9   :  { %v4226_v14 = vpop.permute.xlu1 %4225 }
 0xeea   :  { %v3997_v15 = vpop.permute.xlu0 %3996 }
 0xeed   :  { %v4224_v16 = vpop.permute.xlu1 %4223 }
 0xeee   :  { %v3995_v2 = vpop.permute.xlu0 %3994  ;;  %5674 = vmatprep.mubr.msk.f32.mxu1 %vm156_vm1, %v4224_v16 }
 0xeef   :  { %5642 = vmatprep.mubr.msk.f32.mxu0 %vm156_vm1, %v3995_v2  ;;  %5675 = vmatmul.mubr.msk.f32.gmra.mrb[64].mxu1 %vm156_vm1, %v4226_v14 }
 0xef0   :  { %5643 = vmatmul.mubr.msk.f32.gmra.mrb[66].mxu0 %vm156_vm1, %v3997_v15 }
 0xef1   :  { %v4230_v20 = vpop.permute.xlu1 %4229 }
 0xef2   :  { %v4001_v5 = vpop.permute.xlu0 %4000 }
 0xef5   :  { %v4228_v11 = vpop.permute.xlu1 %4227 }
 0xef6   :  { %v3999_v13 = vpop.permute.xlu0 %3998  ;;  %5677 = vmatprep.mubr.msk.f32.mxu1 %vm156_vm1, %v4228_v11 }
 0xef7   :  { %5645 = vmatprep.mubr.msk.f32.mxu0 %vm156_vm1, %v3999_v13  ;;  %5678 = vmatmul.mubr.msk.f32.gmra.mrb[66].mxu1 %vm156_vm1, %v4230_v20 }
 0xef8   :  { %5646 = vmatmul.mubr.msk.f32.gmra.mrb[68].mxu0 %vm156_vm1, %v4001_v5 }
 0xef9   :  { %v4234_v17 = vpop.permute.xlu1 %4233 }
 0xefa   :  { %v4005_v18 = vpop.permute.xlu0 %4004 }
 0xefd   :  { %v4232_v19 = vpop.permute.xlu1 %4231 }
 0xefe   :  { %v4003_v21 = vpop.permute.xlu0 %4002  ;;  %5680 = vmatprep.mubr.msk.f32.mxu1 %vm156_vm1, %v4232_v19 }
 0xeff   :  { %5648 = vmatprep.mubr.msk.f32.mxu0 %vm156_vm1, %v4003_v21  ;;  %5681 = vmatmul.mubr.msk.f32.gmra.mrb[68].mxu1 %vm156_vm1, %v4234_v17 }
 0xf00   :  { %5649 = vmatmul.mubr.msk.f32.gmra.mrb[70].mxu0 %vm156_vm1, %v4005_v18 }
 0xf01   :  { %v4238_v22 = vpop.permute.xlu1 %4237 }
 0xf02   :  { %v4009_v23 = vpop.permute.xlu0 %4008 }
 0xf05   :  { %v4236_v24 = vpop.permute.xlu1 %4235 }
 0xf06   :  { %v4007_v25 = vpop.permute.xlu0 %4006  ;;  %5683 = vmatprep.mubr.msk.f32.mxu1 %vm156_vm1, %v4236_v24 }
 0xf07   :  { %5651 = vmatprep.mubr.msk.f32.mxu0 %vm156_vm1, %v4007_v25  ;;  %5684 = vmatmul.mubr.msk.f32.gmra.mrb[70].mxu1 %vm156_vm1, %v4238_v22 }
 0xf08   :  { %5652 = vmatmul.mubr.msk.f32.gmra.mrb[72].mxu0 %vm156_vm1, %v4009_v23 }
 0xf09   :  { %v4242_v26 = vpop.permute.xlu1 %4241 }
 0xf0a   :  { %v4013_v27 = vpop.permute.xlu0 %4012 }
 0xf0d   :  { %v4240_v28 = vpop.permute.xlu1 %4239 }
 0xf0e   :  { %v4011_v29 = vpop.permute.xlu0 %4010  ;;  %5686 = vmatprep.mubr.msk.f32.mxu1 %vm156_vm1, %v4240_v28 }
 0xf0f   :  { %5654 = vmatprep.mubr.msk.f32.mxu0 %vm156_vm1, %v4011_v29  ;;  %5687 = vmatmul.mubr.msk.f32.gmra.mrb[72].mxu1 %vm156_vm1, %v4242_v26 }
 0xf10   :  { %5655 = vmatmul.mubr.msk.f32.gmra.mrb[74].mxu0 %vm156_vm1, %v4013_v27 }
 0xf11   :  { %v4246_v30 = vpop.permute.xlu1 %4245 }
 0xf12   :  { %v4017_v31 = vpop.permute.xlu0 %4016 }
 0xf15   :  { %v4244_v32 = vpop.permute.xlu1 %4243 }
 0xf16   :  { %v4015_v33 = vpop.permute.xlu0 %4014  ;;  %5689 = vmatprep.mubr.msk.f32.mxu1 %vm156_vm1, %v4244_v32 }
 0xf17   :  { %5657 = vmatprep.mubr.msk.f32.mxu0 %vm156_vm1, %v4015_v33  ;;  %5690 = vmatmul.mubr.msk.f32.gmra.mrb[74].mxu1 %vm156_vm1, %v4246_v30 }
 0xf18   :  { %5658 = vmatmul.mubr.msk.f32.gmra.mrb[76].mxu0 %vm156_vm1, %v4017_v31 }
 0xf19   :  { %v4248_v34 = vpop.permute.xlu1 %4247 }
 0xf1a   :  { %v4019_v36 = vpop.permute.xlu0 %4018  ;;  %5692 = vmatprep.mubr.msk.f32.mxu1 %vm156_vm1, %v4248_v34 }
 0xf1b   :  { %5660 = vmatprep.mubr.msk.f32.mxu0 %vm156_vm1, %v4019_v36 }
 0xf1d   :  { %v4250_v37 = vpop.permute.xlu1 %4249 }
 0xf1e   :  { %v4021_v38 = vpop.permute.xlu0 %4020  ;;  %5693 = vmatmul.mubr.msk.f32.gmra.mrb[76].mxu1 %vm156_vm1, %v4250_v37 }
 0xf1f   :  { %5661 = vmatmul.mubr.msk.f32.gmra.mrb[78].mxu0 %vm156_vm1, %v4021_v38 }
 0xf44   :  { %v5609_v0 = vpop.f32.mrb[46].mxu1 }
 0xf45   :  { %3971 = vst.msk [vmem:[#allocation13 + $0x8] sm:$0xff] %vm686_vm4, %v5609_v0  ;;  %v3891_v35 = vpop.f32.mrb[47].mxu1 }
 0xf46   :  { %3970 = vst.msk [vmem:[#allocation13] sm:$0xff] %vm686_vm4, %v3891_v35 }
 0xf48   :  { %v5612_v39 = vpop.f32.mrb[48].mxu1 }
 0xf49   :  { %3973 = vst.msk [vmem:[#allocation13 + $0x18] sm:$0xff] %vm686_vm4, %v5612_v39  ;;  %v3901_v40 = vpop.f32.mrb[49].mxu1 }
 0xf4a   :  { %3972 = vst.msk [vmem:[#allocation13 + $0x10] sm:$0xff] %vm686_vm4, %v3901_v40 }
 0xf4c   :  { %v5615_v41 = vpop.f32.mrb[50].mxu1 }
 0xf4d   :  { %3975 = vst.msk [vmem:[#allocation13 + $0x28] sm:$0xff] %vm686_vm4, %v5615_v41  ;;  %v3911_v42 = vpop.f32.mrb[51].mxu1 }
 0xf4e   :  { %3974 = vst.msk [vmem:[#allocation13 + $0x20] sm:$0xff] %vm686_vm4, %v3911_v42 }
 0xf50   :  { %v5618_v43 = vpop.f32.mrb[52].mxu1 }
 0xf51   :  { %3977 = vst.msk [vmem:[#allocation13 + $0x38] sm:$0xff] %vm686_vm4, %v5618_v43  ;;  %v3921_v44 = vpop.f32.mrb[53].mxu1 }
 0xf52   :  { %3976 = vst.msk [vmem:[#allocation13 + $0x30] sm:$0xff] %vm686_vm4, %v3921_v44 }
 0xf54   :  { %v5621_v45 = vpop.f32.mrb[54].mxu1 }
 0xf55   :  { %3979 = vst.msk [vmem:[#allocation13 + $0xc8] sm:$0xff] %vm686_vm4, %v5621_v45  ;;  %v3931_v46 = vpop.f32.mrb[55].mxu1 }
 0xf56   :  { %3978 = vst.msk [vmem:[#allocation13 + $0xc0] sm:$0xff] %vm686_vm4, %v3931_v46 }
 0xf58   :  { %v5624_v47 = vpop.f32.mrb[56].mxu1 }
 0xf59   :  { %3981 = vst.msk [vmem:[#allocation13 + $0xd8] sm:$0xff] %vm686_vm4, %v5624_v47  ;;  %v3941_v48 = vpop.f32.mrb[57].mxu1 }
 0xf5a   :  { %3980 = vst.msk [vmem:[#allocation13 + $0xd0] sm:$0xff] %vm686_vm4, %v3941_v48 }
 0xf5c   :  { %v5627_v49 = vpop.f32.mrb[58].mxu1 }
 0xf5d   :  { %3983 = vst.msk [vmem:[#allocation13 + $0xe8] sm:$0xff] %vm686_vm4, %v5627_v49  ;;  %v3951_v50 = vpop.f32.mrb[59].mxu1 }
 0xf5e   :  { %3982 = vst.msk [vmem:[#allocation13 + $0xe0] sm:$0xff] %vm686_vm4, %v3951_v50 }
 0xf60   :  { %v5630_v51 = vpop.f32.mrb[60].mxu1 }
 0xf61   :  { %3985 = vst.msk [vmem:[#allocation13 + $0xf8] sm:$0xff] %vm686_vm4, %v5630_v51  ;;  %v3961_v52 = vpop.f32.mrb[61].mxu1 }
 0xf62   :  { %3984 = vst.msk [vmem:[#allocation13 + $0xf0] sm:$0xff] %vm686_vm4, %v3961_v52 }
 0xfb7   :  { %v5641_v53 = vpop.f32.mrb[64].mxu0 }
 0xfb8   :  { %4200 = vst.msk [vmem:[#allocation13 + $0x48] sm:$0xff] %vm686_vm4, %v5641_v53  ;;  %v4120_v54 = vpop.f32.mrb[65].mxu0 }
 0xfb9   :  { %4199 = vst.msk [vmem:[#allocation13 + $0x40] sm:$0xff] %vm686_vm4, %v4120_v54 }
 0xfbb   :  { %v5673_v55 = vpop.f32.mrb[62].mxu1 }
 0xfbc   :  { %4429 = vst.msk [vmem:[#allocation13 + $0x88] sm:$0xff] %vm686_vm4, %v5673_v55  ;;  %v4349_v56 = vpop.f32.mrb[63].mxu1 }
 0xfbd   :  { %4428 = vst.msk [vmem:[#allocation13 + $0x80] sm:$0xff] %vm686_vm4, %v4349_v56 }
 0xfc2   :  { %v5676_v57 = vpop.f32.mrb[64].mxu1 }
 0xfc3   :  { %v5644_v58 = vpop.f32.mrb[66].mxu0  ;;  %4431 = vst.msk [vmem:[#allocation13 + $0x98] sm:$0xff] %vm686_vm4, %v5676_v57  ;;  %v4359_v59 = vpop.f32.mrb[65].mxu1 }
 0xfc4   :  { %4202 = vst.msk [vmem:[#allocation13 + $0x58] sm:$0xff] %vm686_vm4, %v5644_v58  ;;  %v4130_v60 = vpop.f32.mrb[67].mxu0  ;;  %4430 = vst.msk [vmem:[#allocation13 + $0x90] sm:$0xff] %vm686_vm4, %v4359_v59 }
 0xfc5   :  { %4201 = vst.msk [vmem:[#allocation13 + $0x50] sm:$0xff] %vm686_vm4, %v4130_v60 }
 0xfca   :  { %v5679_v61 = vpop.f32.mrb[66].mxu1 }
 0xfcb   :  { %v5647_v62 = vpop.f32.mrb[68].mxu0  ;;  %4433 = vst.msk [vmem:[#allocation13 + $0xa8] sm:$0xff] %vm686_vm4, %v5679_v61  ;;  %v4369_v63 = vpop.f32.mrb[67].mxu1 }
 0xfcc   :  { %4204 = vst.msk [vmem:[#allocation13 + $0x68] sm:$0xff] %vm686_vm4, %v5647_v62  ;;  %v4140_v1 = vpop.f32.mrb[69].mxu0  ;;  %4432 = vst.msk [vmem:[#allocation13 + $0xa0] sm:$0xff] %vm686_vm4, %v4369_v63 }
 0xfcd   :  { %4203 = vst.msk [vmem:[#allocation13 + $0x60] sm:$0xff] %vm686_vm4, %v4140_v1 }
 0xfd2   :  { %v5682_v3 = vpop.f32.mrb[68].mxu1 }
 0xfd3   :  { %v5650_v4 = vpop.f32.mrb[70].mxu0  ;;  %4435 = vst.msk [vmem:[#allocation13 + $0xb8] sm:$0xff] %vm686_vm4, %v5682_v3  ;;  %v4379_v6 = vpop.f32.mrb[69].mxu1 }
 0xfd4   :  { %4206 = vst.msk [vmem:[#allocation13 + $0x78] sm:$0xff] %vm686_vm4, %v5650_v4  ;;  %v4150_v7 = vpop.f32.mrb[71].mxu0  ;;  %4434 = vst.msk [vmem:[#allocation13 + $0xb0] sm:$0xff] %vm686_vm4, %v4379_v6 }
 0xfd5   :  { %4205 = vst.msk [vmem:[#allocation13 + $0x70] sm:$0xff] %vm686_vm4, %v4150_v7 }
 0xfda   :  { %v5685_v8 = vpop.f32.mrb[70].mxu1 }
 0xfdb   :  { %v5653_v9 = vpop.f32.mrb[72].mxu0  ;;  %4437 = vst.msk [vmem:[#allocation13 + $0x148] sm:$0xff] %vm686_vm4, %v5685_v8  ;;  %v4389_v10 = vpop.f32.mrb[71].mxu1 }
 0xfdc   :  { %4208 = vst.msk [vmem:[#allocation13 + $0x108] sm:$0xff] %vm686_vm4, %v5653_v9  ;;  %v4160_v12 = vpop.f32.mrb[73].mxu0  ;;  %4436 = vst.msk [vmem:[#allocation13 + $0x140] sm:$0xff] %vm686_vm4, %v4389_v10 }
 0xfdd   :  { %4207 = vst.msk [vmem:[#allocation13 + $0x100] sm:$0xff] %vm686_vm4, %v4160_v12 }
 0xfe2   :  { %v5688_v14 = vpop.f32.mrb[72].mxu1 }
 0xfe3   :  { %v5656_v15 = vpop.f32.mrb[74].mxu0  ;;  %4439 = vst.msk [vmem:[#allocation13 + $0x158] sm:$0xff] %vm686_vm4, %v5688_v14  ;;  %v4399_v16 = vpop.f32.mrb[73].mxu1 }
 0xfe4   :  { %4210 = vst.msk [vmem:[#allocation13 + $0x118] sm:$0xff] %vm686_vm4, %v5656_v15  ;;  %v4170_v2 = vpop.f32.mrb[75].mxu0  ;;  %4438 = vst.msk [vmem:[#allocation13 + $0x150] sm:$0xff] %vm686_vm4, %v4399_v16 }
 0xfe5   :  { %4209 = vst.msk [vmem:[#allocation13 + $0x110] sm:$0xff] %vm686_vm4, %v4170_v2 }
 0xfea   :  { %v5691_v20 = vpop.f32.mrb[74].mxu1 }
 0xfeb   :  { %v5659_v5 = vpop.f32.mrb[76].mxu0  ;;  %4441 = vst.msk [vmem:[#allocation13 + $0x168] sm:$0xff] %vm686_vm4, %v5691_v20  ;;  %v4409_v11 = vpop.f32.mrb[75].mxu1 }
 0xfec   :  { %4212 = vst.msk [vmem:[#allocation13 + $0x128] sm:$0xff] %vm686_vm4, %v5659_v5  ;;  %v4180_v13 = vpop.f32.mrb[77].mxu0  ;;  %4440 = vst.msk [vmem:[#allocation13 + $0x160] sm:$0xff] %vm686_vm4, %v4409_v11 }
 0xfed   :  { %4211 = vst.msk [vmem:[#allocation13 + $0x120] sm:$0xff] %vm686_vm4, %v4180_v13 }
 0xff1   :  { %v5694_v17 = vpop.f32.mrb[76].mxu1 }
 0xff2   :  { %v5662_v18 = vpop.f32.mrb[78].mxu0  ;;  %4443 = vst.msk [vmem:[#allocation13 + $0x178] sm:$0xff] %vm686_vm4, %v5694_v17  ;;  %v4419_v19 = vpop.f32.mrb[77].mxu1 }
 0xff3   :  { %4214 = vst.msk [vmem:[#allocation13 + $0x138] sm:$0xff] %vm686_vm4, %v5662_v18  ;;  %v4190_v21 = vpop.f32.mrb[79].mxu0  ;;  %4442 = vst.msk [vmem:[#allocation13 + $0x170] sm:$0xff] %vm686_vm4, %v4419_v19 }
 0xff4   :  { %4213 = vst.msk [vmem:[#allocation13 + $0x130] sm:$0xff] %vm686_vm4, %v4190_v21 }
 0xff5   :  { %6137 = shalt.err (!%p6134_p10)
}
 0xff6   :  { %s6138_s10 = scalar_lea.hbm %s7292_s20, 6144 }
 0xff7   :  { %p6139_p11 = scmp.ne.s32.totalorder %s7292_s20, %s6138_s10  ;;  %p6142_p12 = scmp.lt.u32.totalorder %s6138_s10, %s7292_s20 }
 0xff9   :  { %p6144_p13 = pnand %p6142_p12, %p6139_p11 }
 0xffb   :  { %6147 = shalt.err (!%p6144_p13)
}
 0xffc   :  { %4455 = dma.vmem_to_hbm [thread:$0]  %s4450_s23, 6144, %s7292_s20, [#allocation4], %s6164_s17, %s6164_s17, %s6165_s27  }
 0xffd   :  { %6156 = dma.done.wait [#allocation4], 6144  }
 0xffe   :  { %6157 = vsyncadd [#allocation4], 4294961152 }
 0xfff   :  { %4459 = vsyncpa [#allocation3], 1 }
0x1000   :  { %4460 = vsyncpa [#allocation6], 1 }
0x1001   :  { %4461 = vsyncpa [#allocation9], 1 }
0x1002   :  { %4462 = vsyncpa [#allocation12], 1 }
0x1003   :  { %4463 = vsyncpa [#allocation4], 1 }

</bundles_post_ra>
